<compile_context>
chip_gen: v7x
topology: tpu7x:2x2x1
jax: 0.10.0
libtpu: 0.0.40
codegen_flags: <defaults>
</compile_context>

<pallas_src>
import functools

import jax
import jax.numpy as jnp
from jax.experimental import pallas as pl
from jax.experimental.pallas import tpu as pltpu

L = 360            # 360 -> conv1(/5) 72 -> conv2(/3) 24 -> maxpool(/2) 12
EPS = 1e-5
_TB_TARGET = 256   # batch-tile target (v6e/v7x sweet spot; v5e may prefer 128,
                   # v6e can sweep up to 1024 with a higher vmem limit)


def _round_up(n, m):
    return ((n + m - 1) // m) * m


def _pick_tb(batch, target=_TB_TARGET):
    """Batch tile: big enough to fill MXU rows, >=2 tiles so a v7x megacore can
    split the grid, always a multiple of 8 (sublane aligned)."""
    if batch <= 8:
        return 8
    half = _round_up((batch + 1) // 2, 8)
    return max(8, min(target, half))


def _vmem_limit_bytes(tb, compute_itemsize=2):
    """Generous scoped-VMEM estimate for the chosen tile."""
    rows = 24 * tb
    act = (rows * 16 * compute_itemsize * 2          # input tile (double buffered)
           + rows * 192 * (4 + compute_itemsize)     # h1 f32 acc + bf16 copy
           + rows * 64 * 4                           # h2p
           + 12 * tb * 64 * (4 + compute_itemsize)   # pooled + h2
           + tb * 384 * 4 * 3                        # fc1 acc + inter1 (+ dbuf)
           + tb * 128 * 4 * 2)                       # packed output (dbuf)
    wts = 2 * ((16 * 192 + 192 * 64 + 12 * 64 * 384 + 384 * 64) * compute_itemsize
               + (64 * 16 + 8 * 384) * 4)
    return int(min(56 << 20, max(32 << 20, 2 * (act + wts))))


def target_cnn_kernel(
    x_ref,                       # (24*TB, 16)  compute dtype (bf16)
    w1_ref,                      # (16, 192)    bf16  conv1 block-diag, BN scale folded
    w2_ref,                      # (192, 64)    bf16  conv2 packed along K
    wf1_ref,                     # (12, 64, 384) bf16 fc1 split per pooled time step
    wf2_ref,                     # (384, 64)    bf16
    wf3_ref,                     # (64, 16)     f32
    vec_ref,                     # (8, 384)     f32   [t1|s2|t2|bf1|bf2|bf3|wp|bp]
    inter1_ref,                  # (TB, 384)    f32
    packed_ref,                  # (TB, 128)    f32   [inter2|inter3|result|pad]
):
    tb = inter1_ref.shape[0]
    half = 12 * tb
    cdt = w1_ref.dtype           # MXU compute dtype (bf16)

    t1 = vec_ref[0:1, 0:192]     # conv1 bias + BN1 shift (scale folded into w1)
    s2 = vec_ref[1:2, 0:64]      # BN2 scale
    t2 = vec_ref[2:3, 0:64]      # conv2 bias * s2 + BN2 shift
    bf1 = vec_ref[3:4, 0:384]
    bf2 = vec_ref[4:5, 0:64]
    bf3 = vec_ref[5:6, 0:16]
    wp = vec_ref[6:7, 0:16]
    bpv = vec_ref[7:8, 0:1]

    # ---- Conv1d(1->64, k=5, s=5) + BatchNorm1d + ReLU (BN scale pre-folded) --
    h1 = jnp.dot(x_ref[...], w1_ref[...],
                 preferred_element_type=jnp.float32) + t1
    h1 = jnp.maximum(h1, 0.0).astype(cdt)                        # (24*tb, 192)

    # ---- Conv1d(64->64, k=3, s=3): single K=192 matmul (bias folded into t2) -
    h2p = jnp.dot(h1, w2_ref[...],
                  preferred_element_type=jnp.float32)            # (24*tb, 64)

    # ---- MaxPool1d(2,2) + BatchNorm1d + ReLU ---------------------------------
    pooled = jnp.maximum(h2p[:half, :], h2p[half:, :])           # (12*tb, 64)
    h2 = jnp.maximum(pooled * s2 + t2, 0.0).astype(cdt)          # rows k*tb + b

    # ---- fc1: 12 accumulating K=64 dots (no lane repack of the activation) ---
    acc = jnp.zeros((tb, 384), jnp.float32)
    for k in range(12):
        acc = acc + jnp.dot(h2[k * tb:(k + 1) * tb, :], wf1_ref[k],
                            preferred_element_type=jnp.float32)
    inter1 = jnp.maximum(acc + bf1, 0.0)
    inter1_ref[...] = inter1

    # ---- fc2 / fc3 / predict --------------------------------------------------
    inter2 = jnp.maximum(
        jnp.dot(inter1.astype(cdt), wf2_ref[...],
                preferred_element_type=jnp.float32) + bf2, 0.0)  # (tb, 64)
    inter3 = jnp.maximum(
        jnp.dot(inter2, wf3_ref[...],
                preferred_element_type=jnp.float32) + bf3, 0.0)  # (tb, 16)
    result = jnp.sum(inter3 * wp, axis=1, keepdims=True) + bpv   # (tb, 1)

    # Lane-dense packed writeback: [inter2 | inter3 | result | zero pad] = 128.
    packed_ref[...] = jnp.concatenate(
        [inter2, inter3, result, jnp.zeros((tb, 47), jnp.float32)], axis=1)


def prepare_params(params, compute_dtype=jnp.bfloat16):
    """One-time weight re-layout / BN fold / dtype cast (hoisted out of forward)."""
    (w1, b1, g1, beta1, m1, v1,
     w2, b2, g2, beta2, m2, v2,
     wf1, bf1, wf2, bf2, wf3, bf3, wp, bp) = params

    # Fold BatchNorm running stats (inference mode) and conv biases.
    s1 = g1 / jnp.sqrt(v1 + EPS)
    t1 = beta1 - m1 * s1 + b1 * s1          # conv1 bias folded into BN1 shift
    s2 = g2 / jnp.sqrt(v2 + EPS)
    t2 = beta2 - m2 * s2 + b2 * s2          # conv2 bias folded into BN2 shift
    # (s2 stays a separate multiply: it is applied AFTER the max-pool, so it
    #  cannot be folded into w2 when gamma may be negative.)

    # conv1 as block-diagonal (16, 192): rows j*5+kk, cols j*64+o (j = conv2 tap),
    # BN1 scale folded into the columns; K padded 15->16 (zero row).
    # NOTE: 2/3 of this block is structural zeros -> 3x redundant MXU work at
    # K=16, which is negligible next to conv2/fc1.
    w1c = jnp.transpose(w1[:, 0, :]) * s1[None, :]               # (5, 64)
    w1blk = jnp.zeros((16, 192), jnp.float32)
    for j in range(3):
        w1blk = w1blk.at[j * 5:(j + 1) * 5, j * 64:(j + 1) * 64].set(w1c)

    # conv2 packed along K: rows = tap j * 64 + in-channel i.
    w2cat = jnp.transpose(w2, (2, 1, 0)).reshape(192, 64)

    # fc1 pre-split per pooled time step k (PyTorch flatten index is c*12 + k).
    wf1k = jnp.transpose(wf1.reshape(384, 64, 12), (2, 1, 0))    # (12, 64, 384)
    wf2k = jnp.transpose(wf2)                                    # (384, 64)
    wf3k = jnp.transpose(wf3)                                    # (64, 16)

    # Consolidated small vectors, one per sublane row, lane offset 0.
    vec = jnp.zeros((8, 384), jnp.float32)
    vec = vec.at[0, :192].set(jnp.tile(t1, 3))
    vec = vec.at[1, :64].set(s2)
    vec = vec.at[2, :64].set(t2)
    vec = vec.at[3, :].set(bf1)
    vec = vec.at[4, :64].set(bf2)
    vec = vec.at[5, :16].set(bf3)
    vec = vec.at[6, :16].set(wp[0])
    vec = vec.at[7, 0].set(bp[0])

    cdt = compute_dtype
    return (w1blk.astype(cdt), w2cat.astype(cdt), wf1k.astype(cdt),
            wf2k.astype(cdt), wf3k.astype(jnp.float32), vec)


def _resident_spec(arr):
    # Constant index map -> block fetched once, stays VMEM-resident over the grid.
    nd = arr.ndim
    return pl.BlockSpec(arr.shape, lambda bt, _nd=nd: (0,) * _nd)


@functools.partial(jax.jit, static_argnames=("tb",))
def target_cnn_forward(x, prep, *, tb=None):
    """x: (B, 1, 360) float (PyTorch NCW). Returns ([inter1, inter2, inter3], result)."""
    b = x.shape[0]
    assert x.shape[1:] == (1, L), f"expected (B,1,{L}), got {x.shape}"
    if tb is None:
        tb = _pick_tb(b)
    tb = max(8, _round_up(tb, 8))
    b_pad = _round_up(b, tb)                 # ragged batch: zero-pad to a tile multiple
    nt = b_pad // tb

    xp = x.astype(jnp.float32)
    if b_pad != b:
        xp = jnp.pad(xp, ((0, b_pad - b), (0, 0), (0, 0)))

    # Input glue: kernel row = bt*(24*tb) + parity*(12*tb) + k*tb + b_local,
    # 15 raw samples per row padded to 16 lanes, cast to the MXU compute dtype.
    xg = (xp.reshape(nt, tb, 12, 2, 15)
            .transpose(0, 3, 2, 1, 4)
            .reshape(nt * 24 * tb, 15))
    xg = jnp.pad(xg, ((0, 0), (0, 1))).astype(prep[0].dtype)

    out_shapes = (
        jax.ShapeDtypeStruct((b_pad, 384), jnp.float32),   # inter1
        jax.ShapeDtypeStruct((b_pad, 128), jnp.float32),   # packed inter2|inter3|result
    )
    in_specs = ([pl.BlockSpec((24 * tb, 16), lambda bt: (bt, 0))]
                + [_resident_spec(w) for w in prep])
    out_specs = (pl.BlockSpec((tb, 384), lambda bt: (bt, 0)),
                 pl.BlockSpec((tb, 128), lambda bt: (bt, 0)))

    inter1_full, packed = pl.pallas_call(
        target_cnn_kernel,
        out_shape=out_shapes,
        grid=(nt,),
        in_specs=in_specs,
        out_specs=out_specs,
        compiler_params=pltpu.CompilerParams(
            dimension_semantics=("parallel",),             # v7x: split tiles across TCs
            vmem_limit_bytes=_vmem_limit_bytes(tb)),
    )(xg, *prep)

    inter1 = inter1_full[:b]
    inter2 = packed[:b, 0:64]
    inter3 = packed[:b, 64:80]
    result = packed[:b, 80:81]
    return [inter1, inter2, inter3], result


def init_params(key):
    ks = jax.random.split(key, 20)

    def rn(k, shape, scale=0.05):
        return (scale * jax.random.normal(k, shape)).astype(jnp.float32)

    w1 = rn(ks[0], (64, 1, 5), 0.2); b1 = rn(ks[1], (64,))
    g1 = (1.0 + 0.1 * jax.random.normal(ks[2], (64,))).astype(jnp.float32)
    beta1 = rn(ks[3], (64,))
    m1 = rn(ks[4], (64,), 0.1)
    v1 = (0.5 + jax.random.uniform(ks[5], (64,))).astype(jnp.float32)
    w2 = rn(ks[6], (64, 64, 3), 0.08); b2 = rn(ks[7], (64,))
    g2 = (1.0 + 0.1 * jax.random.normal(ks[8], (64,))).astype(jnp.float32)
    beta2 = rn(ks[9], (64,))
    m2 = rn(ks[10], (64,), 0.1)
    v2 = (0.5 + jax.random.uniform(ks[11], (64,))).astype(jnp.float32)
    wf1 = rn(ks[12], (384, 768), 0.03); bf1 = rn(ks[13], (384,))
    wf2 = rn(ks[14], (64, 384), 0.05); bf2 = rn(ks[15], (64,))
    wf3 = rn(ks[16], (16, 64), 0.1); bf3 = rn(ks[17], (16,))
    wp = rn(ks[18], (1, 16), 0.2); bp = rn(ks[19], (1,))
    return (w1, b1, g1, beta1, m1, v1, w2, b2, g2, beta2, m2, v2,
            wf1, bf1, wf2, bf2, wf3, bf3, wp, bp)


def reference_forward(x, params):
    """Pure-JAX reference mirroring the PyTorch forward (eval-mode BN)."""
    (w1, b1, g1, beta1, m1, v1,
     w2, b2, g2, beta2, m2, v2,
     wf1, bf1, wf2, bf2, wf3, bf3, wp, bp) = params
    b = x.shape[0]
    h = jnp.einsum('btk,ok->bto', x.reshape(b, 72, 5), w1[:, 0, :]) + b1     # (b,72,64)
    h = (h - m1) / jnp.sqrt(v1 + EPS) * g1 + beta1
    h = jnp.maximum(h, 0.0)
    h = h.reshape(b, 24, 3, 64)
    h = jnp.einsum('btjc,ocj->bto', h, w2) + b2                              # (b,24,64)
    h = h.reshape(b, 12, 2, 64).max(axis=2)                                  # MaxPool1d(2,2)
    h = (h - m2) / jnp.sqrt(v2 + EPS) * g2 + beta2
    h = jnp.maximum(h, 0.0)
    flat = jnp.transpose(h, (0, 2, 1)).reshape(b, 768)                       # PyTorch .view order
    i1 = jnp.maximum(flat @ wf1.T + bf1, 0.0)
    i2 = jnp.maximum(i1 @ wf2.T + bf2, 0.0)
    i3 = jnp.maximum(i2 @ wf3.T + bf3, 0.0)
    res = i3 @ wp.T + bp
    return [i1, i2, i3], res


if __name__ == "__main__":
    B = 20                                     # small & ragged: pads to 2 tiles of TB=16
    key = jax.random.PRNGKey(0)
    pkey, xkey = jax.random.split(key)
    params = init_params(pkey)
    prep = prepare_params(params)              # one-time re-layout / BN fold / bf16 cast
    x = jax.random.normal(xkey, (B, 1, L), dtype=jnp.float32)

    outs = jax.block_until_ready(target_cnn_forward(x, prep))
    (i1, i2, i3), res = outs

    (r1, r2, r3), rres = reference_forward(x, params)
    # conv1/conv2/fc1/fc2 MXU operands are bf16 (f32 accumulation), so the
    # comparison against the all-f32 reference is held to 5e-2 (observed error
    # is a few 1e-3; prepare_params(params, compute_dtype=jnp.float32) matches
    # much tighter, limited only by default TPU matmul precision).
    for name, got, want in (("inter1", i1, r1), ("inter2", i2, r2),
                            ("inter3", i3, r3), ("result", res, rres)):
        err = float(jnp.max(jnp.abs(got - want)))
        assert err < 5e-2, f"{name} mismatch vs reference: max abs err = {err}"

    print("KERNEL_OK")
</pallas_src>

<mosaic_0001>
module attributes {stable_mosaic.version = 11 : i64} {
  func.func @target_cnn_kernel(%arg0: i32, %arg1: memref<384x16xbf16, #tpu.memory_space<vmem>>, %arg2: memref<16x192xbf16, #tpu.memory_space<vmem>>, %arg3: memref<192x64xbf16, #tpu.memory_space<vmem>>, %arg4: memref<12x64x384xbf16, #tpu.memory_space<vmem>>, %arg5: memref<384x64xbf16, #tpu.memory_space<vmem>>, %arg6: memref<64x16xf32, #tpu.memory_space<vmem>>, %arg7: memref<8x384xf32, #tpu.memory_space<vmem>>, %arg8: memref<16x384xf32, #tpu.memory_space<vmem>>, %arg9: memref<16x128xf32, #tpu.memory_space<vmem>>) attributes {dimension_semantics = [#tpu.dimension_semantics<parallel>], iteration_bounds = array<i64: 2>, scalar_prefetch = 0 : i64, scratch_operands = 0 : i64, tpu.core_type = #tpu.core_type<tc>, window_params = [{transform_indices = @transform_0, window_bounds = array<i64: 384, 16>}, {pipeline_mode = #tpu.pipeline_mode<synchronous>, transform_indices = @transform_1, window_bounds = array<i64: 16, 192>}, {pipeline_mode = #tpu.pipeline_mode<synchronous>, transform_indices = @transform_2, window_bounds = array<i64: 192, 64>}, {pipeline_mode = #tpu.pipeline_mode<synchronous>, transform_indices = @transform_3, window_bounds = array<i64: 12, 64, 384>}, {pipeline_mode = #tpu.pipeline_mode<synchronous>, transform_indices = @transform_4, window_bounds = array<i64: 384, 64>}, {pipeline_mode = #tpu.pipeline_mode<synchronous>, transform_indices = @transform_5, window_bounds = array<i64: 64, 16>}, {pipeline_mode = #tpu.pipeline_mode<synchronous>, transform_indices = @transform_6, window_bounds = array<i64: 8, 384>}, {transform_indices = @transform_7, window_bounds = array<i64: 16, 384>}, {transform_indices = @transform_8, window_bounds = array<i64: 16, 128>}]} {
    %c0 = arith.constant 0 : index
    %c0_0 = arith.constant 0 : index
    %0 = vector.load %arg7[%c0, %c0_0] : memref<8x384xf32, #tpu.memory_space<vmem>>, vector<1x192xf32>
    %c1 = arith.constant 1 : index
    %c0_1 = arith.constant 0 : index
    %1 = vector.load %arg7[%c1, %c0_1] : memref<8x384xf32, #tpu.memory_space<vmem>>, vector<1x64xf32>
    %c2 = arith.constant 2 : index
    %c0_2 = arith.constant 0 : index
    %2 = vector.load %arg7[%c2, %c0_2] : memref<8x384xf32, #tpu.memory_space<vmem>>, vector<1x64xf32>
    %c3 = arith.constant 3 : index
    %c0_3 = arith.constant 0 : index
    %3 = vector.load %arg7[%c3, %c0_3] : memref<8x384xf32, #tpu.memory_space<vmem>>, vector<1x384xf32>
    %c4 = arith.constant 4 : index
    %c0_4 = arith.constant 0 : index
    %4 = vector.load %arg7[%c4, %c0_4] : memref<8x384xf32, #tpu.memory_space<vmem>>, vector<1x64xf32>
    %c5 = arith.constant 5 : index
    %c0_5 = arith.constant 0 : index
    %5 = vector.load %arg7[%c5, %c0_5] : memref<8x384xf32, #tpu.memory_space<vmem>>, vector<1x16xf32>
    %c6 = arith.constant 6 : index
    %c0_6 = arith.constant 0 : index
    %6 = vector.load %arg7[%c6, %c0_6] : memref<8x384xf32, #tpu.memory_space<vmem>>, vector<1x16xf32>
    %c7 = arith.constant 7 : index
    %c0_7 = arith.constant 0 : index
    %7 = vector.load %arg7[%c7, %c0_7] : memref<8x384xf32, #tpu.memory_space<vmem>>, vector<1x1xf32>
    %c0_8 = arith.constant 0 : index
    %c0_9 = arith.constant 0 : index
    %8 = vector.load %arg1[%c0_8, %c0_9] : memref<384x16xbf16, #tpu.memory_space<vmem>>, vector<384x16xbf16>
    %c0_10 = arith.constant 0 : index
    %c0_11 = arith.constant 0 : index
    %9 = vector.load %arg2[%c0_10, %c0_11] : memref<16x192xbf16, #tpu.memory_space<vmem>>, vector<16x192xbf16>
    %cst = arith.constant dense<0.000000e+00> : vector<384x192xf32>
    %10 = tpu.matmul %8, %9, %cst {dimension_numbers = #tpu.dot_dimension_numbers<[1], [0], [0], [1], [0, 0, 1, 1], [], []>} : vector<384x16xbf16>, vector<16x192xbf16>, vector<384x192xf32> -> vector<384x192xf32>
    %11 = vector.broadcast %0 : vector<1x192xf32> to vector<384x192xf32>
    %12 = arith.addf %10, %11 : vector<384x192xf32>
    %cst_12 = arith.constant 0.000000e+00 : f32
    %13 = vector.broadcast %cst_12 : f32 to vector<384x192xf32>
    %14 = arith.maximumf %12, %13 : vector<384x192xf32>
    %15 = arith.truncf %14 : vector<384x192xf32> to vector<384x192xbf16>
    %c0_13 = arith.constant 0 : index
    %c0_14 = arith.constant 0 : index
    %16 = vector.load %arg3[%c0_13, %c0_14] : memref<192x64xbf16, #tpu.memory_space<vmem>>, vector<192x64xbf16>
    %cst_15 = arith.constant dense<0.000000e+00> : vector<384x64xf32>
    %17 = tpu.matmul %15, %16, %cst_15 {dimension_numbers = #tpu.dot_dimension_numbers<[1], [0], [0], [1], [0, 0, 1, 1], [], []>} : vector<384x192xbf16>, vector<192x64xbf16>, vector<384x64xf32> -> vector<384x64xf32>
    %18 = vector.extract_strided_slice %17 {offsets = [0, 0], sizes = [192, 64], strides = [1, 1]} : vector<384x64xf32> to vector<192x64xf32>
    %19 = vector.extract_strided_slice %17 {offsets = [192, 0], sizes = [192, 64], strides = [1, 1]} : vector<384x64xf32> to vector<192x64xf32>
    %20 = arith.maximumf %18, %19 : vector<192x64xf32>
    %21 = vector.broadcast %1 : vector<1x64xf32> to vector<192x64xf32>
    %22 = arith.mulf %20, %21 : vector<192x64xf32>
    %23 = vector.broadcast %2 : vector<1x64xf32> to vector<192x64xf32>
    %24 = arith.addf %22, %23 : vector<192x64xf32>
    %cst_16 = arith.constant 0.000000e+00 : f32
    %25 = vector.broadcast %cst_16 : f32 to vector<192x64xf32>
    %26 = arith.maximumf %24, %25 : vector<192x64xf32>
    %27 = arith.truncf %26 : vector<192x64xf32> to vector<192x64xbf16>
    %cst_17 = arith.constant 0.000000e+00 : f32
    %28 = vector.broadcast %cst_17 : f32 to vector<16x384xf32>
    %29 = vector.extract_strided_slice %27 {offsets = [0, 0], sizes = [16, 64], strides = [1, 1]} : vector<192x64xbf16> to vector<16x64xbf16>
    %c0_18 = arith.constant 0 : index
    %c0_19 = arith.constant 0 : index
    %c0_20 = arith.constant 0 : index
    %30 = vector.load %arg4[%c0_18, %c0_19, %c0_20] : memref<12x64x384xbf16, #tpu.memory_space<vmem>>, vector<1x64x384xbf16>
    %31 = vector.shape_cast %30 : vector<1x64x384xbf16> to vector<64x384xbf16>
    %cst_21 = arith.constant dense<0.000000e+00> : vector<16x384xf32>
    %32 = tpu.matmul %29, %31, %cst_21 {dimension_numbers = #tpu.dot_dimension_numbers<[1], [0], [0], [1], [0, 0, 1, 1], [], []>} : vector<16x64xbf16>, vector<64x384xbf16>, vector<16x384xf32> -> vector<16x384xf32>
    %33 = arith.addf %28, %32 : vector<16x384xf32>
    %34 = vector.extract_strided_slice %27 {offsets = [16, 0], sizes = [16, 64], strides = [1, 1]} : vector<192x64xbf16> to vector<16x64xbf16>
    %c1_22 = arith.constant 1 : index
    %c0_23 = arith.constant 0 : index
    %c0_24 = arith.constant 0 : index
    %35 = vector.load %arg4[%c1_22, %c0_23, %c0_24] : memref<12x64x384xbf16, #tpu.memory_space<vmem>>, vector<1x64x384xbf16>
    %36 = vector.shape_cast %35 : vector<1x64x384xbf16> to vector<64x384xbf16>
    %cst_25 = arith.constant dense<0.000000e+00> : vector<16x384xf32>
    %37 = tpu.matmul %34, %36, %cst_25 {dimension_numbers = #tpu.dot_dimension_numbers<[1], [0], [0], [1], [0, 0, 1, 1], [], []>} : vector<16x64xbf16>, vector<64x384xbf16>, vector<16x384xf32> -> vector<16x384xf32>
    %38 = arith.addf %33, %37 : vector<16x384xf32>
    %39 = vector.extract_strided_slice %27 {offsets = [32, 0], sizes = [16, 64], strides = [1, 1]} : vector<192x64xbf16> to vector<16x64xbf16>
    %c2_26 = arith.constant 2 : index
    %c0_27 = arith.constant 0 : index
    %c0_28 = arith.constant 0 : index
    %40 = vector.load %arg4[%c2_26, %c0_27, %c0_28] : memref<12x64x384xbf16, #tpu.memory_space<vmem>>, vector<1x64x384xbf16>
    %41 = vector.shape_cast %40 : vector<1x64x384xbf16> to vector<64x384xbf16>
    %cst_29 = arith.constant dense<0.000000e+00> : vector<16x384xf32>
    %42 = tpu.matmul %39, %41, %cst_29 {dimension_numbers = #tpu.dot_dimension_numbers<[1], [0], [0], [1], [0, 0, 1, 1], [], []>} : vector<16x64xbf16>, vector<64x384xbf16>, vector<16x384xf32> -> vector<16x384xf32>
    %43 = arith.addf %38, %42 : vector<16x384xf32>
    %44 = vector.extract_strided_slice %27 {offsets = [48, 0], sizes = [16, 64], strides = [1, 1]} : vector<192x64xbf16> to vector<16x64xbf16>
    %c3_30 = arith.constant 3 : index
    %c0_31 = arith.constant 0 : index
    %c0_32 = arith.constant 0 : index
    %45 = vector.load %arg4[%c3_30, %c0_31, %c0_32] : memref<12x64x384xbf16, #tpu.memory_space<vmem>>, vector<1x64x384xbf16>
    %46 = vector.shape_cast %45 : vector<1x64x384xbf16> to vector<64x384xbf16>
    %cst_33 = arith.constant dense<0.000000e+00> : vector<16x384xf32>
    %47 = tpu.matmul %44, %46, %cst_33 {dimension_numbers = #tpu.dot_dimension_numbers<[1], [0], [0], [1], [0, 0, 1, 1], [], []>} : vector<16x64xbf16>, vector<64x384xbf16>, vector<16x384xf32> -> vector<16x384xf32>
    %48 = arith.addf %43, %47 : vector<16x384xf32>
    %49 = vector.extract_strided_slice %27 {offsets = [64, 0], sizes = [16, 64], strides = [1, 1]} : vector<192x64xbf16> to vector<16x64xbf16>
    %c4_34 = arith.constant 4 : index
    %c0_35 = arith.constant 0 : index
    %c0_36 = arith.constant 0 : index
    %50 = vector.load %arg4[%c4_34, %c0_35, %c0_36] : memref<12x64x384xbf16, #tpu.memory_space<vmem>>, vector<1x64x384xbf16>
    %51 = vector.shape_cast %50 : vector<1x64x384xbf16> to vector<64x384xbf16>
    %cst_37 = arith.constant dense<0.000000e+00> : vector<16x384xf32>
    %52 = tpu.matmul %49, %51, %cst_37 {dimension_numbers = #tpu.dot_dimension_numbers<[1], [0], [0], [1], [0, 0, 1, 1], [], []>} : vector<16x64xbf16>, vector<64x384xbf16>, vector<16x384xf32> -> vector<16x384xf32>
    %53 = arith.addf %48, %52 : vector<16x384xf32>
    %54 = vector.extract_strided_slice %27 {offsets = [80, 0], sizes = [16, 64], strides = [1, 1]} : vector<192x64xbf16> to vector<16x64xbf16>
    %c5_38 = arith.constant 5 : index
    %c0_39 = arith.constant 0 : index
    %c0_40 = arith.constant 0 : index
    %55 = vector.load %arg4[%c5_38, %c0_39, %c0_40] : memref<12x64x384xbf16, #tpu.memory_space<vmem>>, vector<1x64x384xbf16>
    %56 = vector.shape_cast %55 : vector<1x64x384xbf16> to vector<64x384xbf16>
    %cst_41 = arith.constant dense<0.000000e+00> : vector<16x384xf32>
    %57 = tpu.matmul %54, %56, %cst_41 {dimension_numbers = #tpu.dot_dimension_numbers<[1], [0], [0], [1], [0, 0, 1, 1], [], []>} : vector<16x64xbf16>, vector<64x384xbf16>, vector<16x384xf32> -> vector<16x384xf32>
    %58 = arith.addf %53, %57 : vector<16x384xf32>
    %59 = vector.extract_strided_slice %27 {offsets = [96, 0], sizes = [16, 64], strides = [1, 1]} : vector<192x64xbf16> to vector<16x64xbf16>
    %c6_42 = arith.constant 6 : index
    %c0_43 = arith.constant 0 : index
    %c0_44 = arith.constant 0 : index
    %60 = vector.load %arg4[%c6_42, %c0_43, %c0_44] : memref<12x64x384xbf16, #tpu.memory_space<vmem>>, vector<1x64x384xbf16>
    %61 = vector.shape_cast %60 : vector<1x64x384xbf16> to vector<64x384xbf16>
    %cst_45 = arith.constant dense<0.000000e+00> : vector<16x384xf32>
    %62 = tpu.matmul %59, %61, %cst_45 {dimension_numbers = #tpu.dot_dimension_numbers<[1], [0], [0], [1], [0, 0, 1, 1], [], []>} : vector<16x64xbf16>, vector<64x384xbf16>, vector<16x384xf32> -> vector<16x384xf32>
    %63 = arith.addf %58, %62 : vector<16x384xf32>
    %64 = vector.extract_strided_slice %27 {offsets = [112, 0], sizes = [16, 64], strides = [1, 1]} : vector<192x64xbf16> to vector<16x64xbf16>
    %c7_46 = arith.constant 7 : index
    %c0_47 = arith.constant 0 : index
    %c0_48 = arith.constant 0 : index
    %65 = vector.load %arg4[%c7_46, %c0_47, %c0_48] : memref<12x64x384xbf16, #tpu.memory_space<vmem>>, vector<1x64x384xbf16>
    %66 = vector.shape_cast %65 : vector<1x64x384xbf16> to vector<64x384xbf16>
    %cst_49 = arith.constant dense<0.000000e+00> : vector<16x384xf32>
    %67 = tpu.matmul %64, %66, %cst_49 {dimension_numbers = #tpu.dot_dimension_numbers<[1], [0], [0], [1], [0, 0, 1, 1], [], []>} : vector<16x64xbf16>, vector<64x384xbf16>, vector<16x384xf32> -> vector<16x384xf32>
    %68 = arith.addf %63, %67 : vector<16x384xf32>
    %69 = vector.extract_strided_slice %27 {offsets = [128, 0], sizes = [16, 64], strides = [1, 1]} : vector<192x64xbf16> to vector<16x64xbf16>
    %c8 = arith.constant 8 : index
    %c0_50 = arith.constant 0 : index
    %c0_51 = arith.constant 0 : index
    %70 = vector.load %arg4[%c8, %c0_50, %c0_51] : memref<12x64x384xbf16, #tpu.memory_space<vmem>>, vector<1x64x384xbf16>
    %71 = vector.shape_cast %70 : vector<1x64x384xbf16> to vector<64x384xbf16>
    %cst_52 = arith.constant dense<0.000000e+00> : vector<16x384xf32>
    %72 = tpu.matmul %69, %71, %cst_52 {dimension_numbers = #tpu.dot_dimension_numbers<[1], [0], [0], [1], [0, 0, 1, 1], [], []>} : vector<16x64xbf16>, vector<64x384xbf16>, vector<16x384xf32> -> vector<16x384xf32>
    %73 = arith.addf %68, %72 : vector<16x384xf32>
    %74 = vector.extract_strided_slice %27 {offsets = [144, 0], sizes = [16, 64], strides = [1, 1]} : vector<192x64xbf16> to vector<16x64xbf16>
    %c9 = arith.constant 9 : index
    %c0_53 = arith.constant 0 : index
    %c0_54 = arith.constant 0 : index
    %75 = vector.load %arg4[%c9, %c0_53, %c0_54] : memref<12x64x384xbf16, #tpu.memory_space<vmem>>, vector<1x64x384xbf16>
    %76 = vector.shape_cast %75 : vector<1x64x384xbf16> to vector<64x384xbf16>
    %cst_55 = arith.constant dense<0.000000e+00> : vector<16x384xf32>
    %77 = tpu.matmul %74, %76, %cst_55 {dimension_numbers = #tpu.dot_dimension_numbers<[1], [0], [0], [1], [0, 0, 1, 1], [], []>} : vector<16x64xbf16>, vector<64x384xbf16>, vector<16x384xf32> -> vector<16x384xf32>
    %78 = arith.addf %73, %77 : vector<16x384xf32>
    %79 = vector.extract_strided_slice %27 {offsets = [160, 0], sizes = [16, 64], strides = [1, 1]} : vector<192x64xbf16> to vector<16x64xbf16>
    %c10 = arith.constant 10 : index
    %c0_56 = arith.constant 0 : index
    %c0_57 = arith.constant 0 : index
    %80 = vector.load %arg4[%c10, %c0_56, %c0_57] : memref<12x64x384xbf16, #tpu.memory_space<vmem>>, vector<1x64x384xbf16>
    %81 = vector.shape_cast %80 : vector<1x64x384xbf16> to vector<64x384xbf16>
    %cst_58 = arith.constant dense<0.000000e+00> : vector<16x384xf32>
    %82 = tpu.matmul %79, %81, %cst_58 {dimension_numbers = #tpu.dot_dimension_numbers<[1], [0], [0], [1], [0, 0, 1, 1], [], []>} : vector<16x64xbf16>, vector<64x384xbf16>, vector<16x384xf32> -> vector<16x384xf32>
    %83 = arith.addf %78, %82 : vector<16x384xf32>
    %84 = vector.extract_strided_slice %27 {offsets = [176, 0], sizes = [16, 64], strides = [1, 1]} : vector<192x64xbf16> to vector<16x64xbf16>
    %c11 = arith.constant 11 : index
    %c0_59 = arith.constant 0 : index
    %c0_60 = arith.constant 0 : index
    %85 = vector.load %arg4[%c11, %c0_59, %c0_60] : memref<12x64x384xbf16, #tpu.memory_space<vmem>>, vector<1x64x384xbf16>
    %86 = vector.shape_cast %85 : vector<1x64x384xbf16> to vector<64x384xbf16>
    %cst_61 = arith.constant dense<0.000000e+00> : vector<16x384xf32>
    %87 = tpu.matmul %84, %86, %cst_61 {dimension_numbers = #tpu.dot_dimension_numbers<[1], [0], [0], [1], [0, 0, 1, 1], [], []>} : vector<16x64xbf16>, vector<64x384xbf16>, vector<16x384xf32> -> vector<16x384xf32>
    %88 = arith.addf %83, %87 : vector<16x384xf32>
    %89 = vector.broadcast %3 : vector<1x384xf32> to vector<16x384xf32>
    %90 = arith.addf %88, %89 : vector<16x384xf32>
    %cst_62 = arith.constant 0.000000e+00 : f32
    %91 = vector.broadcast %cst_62 : f32 to vector<16x384xf32>
    %92 = arith.maximumf %90, %91 : vector<16x384xf32>
    %c0_63 = arith.constant 0 : index
    %c0_64 = arith.constant 0 : index
    %93 = vector.load %arg8[%c0_63, %c0_64] : memref<16x384xf32, #tpu.memory_space<vmem>>, vector<16x384xf32>
    tpu.vector_store %arg8[%c0_63, %c0_64], %92 {strides = array<i32>} : memref<16x384xf32, #tpu.memory_space<vmem>>, vector<16x384xf32>,
    %94 = arith.truncf %92 : vector<16x384xf32> to vector<16x384xbf16>
    %c0_65 = arith.constant 0 : index
    %c0_66 = arith.constant 0 : index
    %95 = vector.load %arg5[%c0_65, %c0_66] : memref<384x64xbf16, #tpu.memory_space<vmem>>, vector<384x64xbf16>
    %cst_67 = arith.constant dense<0.000000e+00> : vector<16x64xf32>
    %96 = tpu.matmul %94, %95, %cst_67 {dimension_numbers = #tpu.dot_dimension_numbers<[1], [0], [0], [1], [0, 0, 1, 1], [], []>} : vector<16x384xbf16>, vector<384x64xbf16>, vector<16x64xf32> -> vector<16x64xf32>
    %97 = vector.broadcast %4 : vector<1x64xf32> to vector<16x64xf32>
    %98 = arith.addf %96, %97 : vector<16x64xf32>
    %cst_68 = arith.constant 0.000000e+00 : f32
    %99 = vector.broadcast %cst_68 : f32 to vector<16x64xf32>
    %100 = arith.maximumf %98, %99 : vector<16x64xf32>
    %c0_69 = arith.constant 0 : index
    %c0_70 = arith.constant 0 : index
    %101 = vector.load %arg6[%c0_69, %c0_70] : memref<64x16xf32, #tpu.memory_space<vmem>>, vector<64x16xf32>
    %cst_71 = arith.constant dense<0.000000e+00> : vector<16x16xf32>
    %102 = tpu.matmul %100, %101, %cst_71 {dimension_numbers = #tpu.dot_dimension_numbers<[1], [0], [0], [1], [0, 0, 1, 1], [], []>} : vector<16x64xf32>, vector<64x16xf32>, vector<16x16xf32> -> vector<16x16xf32>
    %103 = vector.broadcast %5 : vector<1x16xf32> to vector<16x16xf32>
    %104 = arith.addf %102, %103 : vector<16x16xf32>
    %cst_72 = arith.constant 0.000000e+00 : f32
    %105 = vector.broadcast %cst_72 : f32 to vector<16x16xf32>
    %106 = arith.maximumf %104, %105 : vector<16x16xf32>
    %107 = vector.broadcast %6 : vector<1x16xf32> to vector<16x16xf32>
    %108 = arith.mulf %106, %107 : vector<16x16xf32>
    %cst_73 = arith.constant dense<0.000000e+00> : vector<16xf32>
    %109 = vector.multi_reduction <add>, %108, %cst_73 [1] : vector<16x16xf32> to vector<16xf32>
    %110 = vector.shape_cast %109 : vector<16xf32> to vector<16x1xf32>
    %111 = vector.broadcast %7 : vector<1x1xf32> to vector<16x1xf32>
    %112 = arith.addf %110, %111 : vector<16x1xf32>
    %cst_74 = arith.constant 0.000000e+00 : f32
    %113 = vector.broadcast %cst_74 : f32 to vector<16x47xf32>
    %114 = tpu.concatenate %100, %106, %112, %113 in 1 : vector<16x64xf32>, vector<16x16xf32>, vector<16x1xf32>, vector<16x47xf32> -> vector<16x128xf32>
    %c0_75 = arith.constant 0 : index
    %c0_76 = arith.constant 0 : index
    %115 = vector.load %arg9[%c0_75, %c0_76] : memref<16x128xf32, #tpu.memory_space<vmem>>, vector<16x128xf32>
    tpu.vector_store %arg9[%c0_75, %c0_76], %114 {strides = array<i32>} : memref<16x128xf32, #tpu.memory_space<vmem>>, vector<16x128xf32>,
    return
  }
  func.func @transform_0(%arg0: i32) -> (i32, i32) {
    %c0_i32 = arith.constant 0 : i32
    %c0_i32_0 = arith.constant 0 : i32
    return %arg0, %c0_i32 : i32, i32
  }
  func.func @transform_1(%arg0: i32) -> (i32, i32) {
    %c0_i32 = arith.constant 0 : i32
    %c0_i32_0 = arith.constant 0 : i32
    %c0_i32_1 = arith.constant 0 : i32
    return %c0_i32, %c0_i32_0 : i32, i32
  }
  func.func @transform_2(%arg0: i32) -> (i32, i32) {
    %c0_i32 = arith.constant 0 : i32
    %c0_i32_0 = arith.constant 0 : i32
    %c0_i32_1 = arith.constant 0 : i32
    return %c0_i32, %c0_i32_0 : i32, i32
  }
  func.func @transform_3(%arg0: i32) -> (i32, i32, i32) {
    %c0_i32 = arith.constant 0 : i32
    %c0_i32_0 = arith.constant 0 : i32
    %c0_i32_1 = arith.constant 0 : i32
    %c0_i32_2 = arith.constant 0 : i32
    return %c0_i32, %c0_i32_0, %c0_i32_1 : i32, i32, i32
  }
  func.func @transform_4(%arg0: i32) -> (i32, i32) {
    %c0_i32 = arith.constant 0 : i32
    %c0_i32_0 = arith.constant 0 : i32
    %c0_i32_1 = arith.constant 0 : i32
    return %c0_i32, %c0_i32_0 : i32, i32
  }
  func.func @transform_5(%arg0: i32) -> (i32, i32) {
    %c0_i32 = arith.constant 0 : i32
    %c0_i32_0 = arith.constant 0 : i32
    %c0_i32_1 = arith.constant 0 : i32
    return %c0_i32, %c0_i32_0 : i32, i32
  }
  func.func @transform_6(%arg0: i32) -> (i32, i32) {
    %c0_i32 = arith.constant 0 : i32
    %c0_i32_0 = arith.constant 0 : i32
    %c0_i32_1 = arith.constant 0 : i32
    return %c0_i32, %c0_i32_0 : i32, i32
  }
  func.func @transform_7(%arg0: i32) -> (i32, i32) {
    %c0_i32 = arith.constant 0 : i32
    %c0_i32_0 = arith.constant 0 : i32
    return %arg0, %c0_i32 : i32, i32
  }
  func.func @transform_8(%arg0: i32) -> (i32, i32) {
    %c0_i32 = arith.constant 0 : i32
    %c0_i32_0 = arith.constant 0 : i32
    return %arg0, %c0_i32 : i32, i32
  }
}

</mosaic_0001>

<bundles_post_ra>
// kernel: target_cnn_forward.1
= control target key start
LH: loop header
LB: loop body
LE: loop exit
PB: predicated region body
PF: predicated region fallthrough
CT: control target
= control target key end

     0   :  { %s5265_s27 = smov 0   ;;  %s6400_s0 = inlined_call_operand.vmem [shape: bf16[768,16], index: 0, kind: input, shape index: {}]   ;;  %s6401_s1 = inlined_call_operand.vmem [shape: bf16[16,192], index: 1, kind: input, shape index: {}]   ;;  %s6402_s2 = inlined_call_operand.vmem [shape: bf16[192,64], index: 2, kind: input, shape index: {}]   ;;  %s6403_s3 = inlined_call_operand.vmem [shape: bf16[12,64,384], index: 3, kind: input, shape index: {}]   ;;  %s6404_s4 = inlined_call_operand.vmem [shape: bf16[384,64], index: 4, kind: input, shape index: {}]   ;;  %s6405_s5 = inlined_call_operand.vmem [shape: f32[64,16], index: 5, kind: input, shape index: {}]   ;;  %s6406_s6 = inlined_call_operand.vmem [shape: f32[8,384], index: 6, kind: input, shape index: {}]   ;;  %s6407_s7 = inlined_call_operand.vmem [shape: f32[32,384], index: 7, kind: output, shape index: {0}]   ;;  %s6408_s8 = inlined_call_operand.vmem [shape: f32[32,128], index: 8, kind: output, shape index: {1}]  }
   0x1 LB: > { %s4125_s28 = sadd.s32 4294967295, %s5213_s27   ;;  %p4129_p0 = scmp.ge.s32.totalorder %s5213_s27, 1  ;;  %s5213_s27 = sphi %s5265_s27, %s19_s27  }
   0x2   : > { %p266_p1 = scmp.lt.s32.totalorder %s5213_s27, 3 }
   0x4   : > { %p267_p2 = pnand %p4129_p0, %p266_p1 }
   0x5   : > { %v4952_v0 = vld [vmem:[%s6401_s1 + $0x4] ss:$8 sps:$4 sm:$0xff] (!%p267_p2)   ;;  %s306_s9 = smul.u32 (!%p267_p2), 48, %s4125_s28  ;;  %v4954_v1 = vld [vmem:[%s6401_s1] ss:$8 sps:$4 sm:$0xff] (!%p267_p2)   ;;  %v5215_v2 = vmov (!%p267_p2), 0   ;;  %v386_v39 = vlaneseq (!%p267_p2) }
   0x6   : > { %270 = sbr.rel (%p267_p2) target bundleno = 1690 (0x69a), region = 48  ;;  %631 = vmatprep.mubr.bf16.mxu0 (!%p267_p2), %v5215_v2  ;;  %vm526_vm0 = vcmask (!%p267_p2), 130048   ;;  %1185 = vmatprep.subr.bf16.mxu1 (!%p267_p2), %v5215_v2  ;;  %v4977_v9 = vld [vmem:[%s6402_s2] sm:$0xff] (!%p267_p2)   ;;  %v4979_v11 = vld [vmem:[%s6402_s2 + $0x8] sm:$0xff] (!%p267_p2)   ;;  %v4980_v12 = vld [vmem:[%s6402_s2 + $0x10] sm:$0xff] (!%p267_p2)   ;;  %vm1112_vm1 = vcmask (!%p267_p2), 523264  }
   0x7   : > { %599 = vmatprep.subr.bf16.mxu0 (!%p267_p2), %v4952_v0  ;;  %p307_p3 = scmp.lt.s32.totalorder (!%p267_p2), %s306_s9, 95  ;;  %1186 = vmatpush1.bf16.msra.mxu1 (!%p267_p2), %v4977_v9  ;;  %v4982_v14 = vld [vmem:[%s6402_s2 + $0x18] sm:$0xff] (!%p267_p2)   ;;  %v4983_v16 = vld [vmem:[%s6402_s2 + $0x20] sm:$0xff] (!%p267_p2)   ;;  %v4984_v17 = vld [vmem:[%s6402_s2 + $0x28] sm:$0xff] (!%p267_p2)   ;;  %v5407_v40 = vshrl.u32 (!%p267_p2), %v386_v39, 7  ;;  %vm5217_vm2 = vmmov (!%p267_p2), 0  }
   0x8   : > { %600 = vmatpush1.bf16.msra.mxu0 (!%p267_p2), %v4954_v1  ;;  %1187 = vmatprep.subr.bf16.mxu1 (!%p267_p2), %v5215_v2  ;;  %v4985_v18 = vld [vmem:[%s6402_s2 + $0x30] sm:$0xff] (!%p267_p2)   ;;  %v4986_v20 = vld [vmem:[%s6402_s2 + $0x38] sm:$0xff] (!%p267_p2)   ;;  %v4987_v21 = vld [vmem:[%s6402_s2 + $0x40] sm:$0xff] (!%p267_p2)   ;;  %s5218_s10 = smov (!%p267_p2), 64   ;;  %s5219_s13 = smov (!%p267_p2), 80   ;;  %vm4025_vm3 = vcmask (!%p267_p2), 654336  }
   0x9   : > { %v4988_v23 = vld [vmem:[%s6402_s2 + $0x48] sm:$0xff] (!%p267_p2)   ;;  %v4989_v25 = vld [vmem:[%s6402_s2 + $0x50] sm:$0xff] (!%p267_p2)   ;;  %v4990_v26 = vld [vmem:[%s6402_s2 + $0x58] sm:$0xff] (!%p267_p2)   ;;  %v388_v41 = vsub.s32 (!%p267_p2), 0, %v5407_v40  ;;  %v392_v43 = vsub.s32 (!%p267_p2), 1, %v5407_v40  ;;  %vm4028_vm4 = vcmask (!%p267_p2), 662528  }
   0xa   : > { %v326_v42 = vld [vmem:[%s6406_s6] ss:$8 sm:$0x3] (!%p267_p2) }
   0xb   : > { %1188 = vmatpush1.bf16.msra.mxu1 (!%p267_p2), %v4979_v11  ;;  %v5416_v44 = vrot.slane (!%p267_p2), %v326_v42, %v388_v41  ;;  %v5420_v45 = vrot.slane (!%p267_p2), %v326_v42, %v392_v43 }
   0xc   : > { %1189 = vmatprep.subr.bf16.mxu1 (!%p267_p2), %v5215_v2 }
   0xd   : > { %s6410_s9 = smov (!%p307_p3, %s306_s9), 95 }
   0xe   : > { %s4130_s12 = sshll.u32 %s6410_s9, 2 }
   0xf   : > { %s5286_s15 = scalar_lea.vmem %s6400_s0, %s4130_s12  ;;  %1190 = vmatpush1.bf16.msra.mxu1 %v4980_v12 }
  0x10   : > { %v4955_v3 = vld [vmem:[%s5286_s15] sm:$0xff]   ;;  %v4956_v4 = vld [vmem:[%s5286_s15 + $0x8] sm:$0xff]   ;;  %v4957_v5 = vld [vmem:[%s5286_s15 + $0x10] sm:$0xff]   ;;  %1191 = vmatprep.subr.bf16.mxu1 %v5215_v2 }
  0x11   : > { %4162 = vmatmul.mubr.msk.bf16.vlgmr.msra.gmra.mrb[0].mxu0 %vm526_vm0, %v4955_v3  ;;  %v4958_v6 = vld [vmem:[%s5286_s15 + $0x18] sm:$0xff]   ;;  %v4959_v7 = vld [vmem:[%s5286_s15 + $0x20] sm:$0xff]   ;;  %v4960_v8 = vld [vmem:[%s5286_s15 + $0x28] sm:$0xff]  }
  0x12   : > { %641 = vmatprep.mubr.bf16.mxu0 %v5215_v2  ;;  %v4961_v10 = vld [vmem:[%s5286_s15 + $0x30] sm:$0xff]   ;;  %v4962_v13 = vld [vmem:[%s5286_s15 + $0x38] sm:$0xff]   ;;  %v4963_v15 = vld [vmem:[%s5286_s15 + $0x40] sm:$0xff]  }
  0x13   : > { %1192 = vmatpush1.bf16.msra.mxu1 %v4982_v14  ;;  %v4964_v19 = vld [vmem:[%s5286_s15 + $0x48] sm:$0xff]   ;;  %v4965_v22 = vld [vmem:[%s5286_s15 + $0x50] sm:$0xff]   ;;  %v4966_v24 = vld [vmem:[%s5286_s15 + $0x58] sm:$0xff]  }
  0x14   : > { %1193 = vmatprep.subr.bf16.mxu1 %v5215_v2  ;;  %v4967_v27 = vld [vmem:[%s5286_s15 + $0x60] sm:$0xff]   ;;  %v4968_v28 = vld [vmem:[%s5286_s15 + $0x68] sm:$0xff]   ;;  %v4969_v29 = vld [vmem:[%s5286_s15 + $0x70] sm:$0xff]  }
  0x15   : > { %v4970_v30 = vld [vmem:[%s5286_s15 + $0x78] sm:$0xff]   ;;  %v4971_v31 = vld [vmem:[%s5286_s15 + $0x80] sm:$0xff]   ;;  %v4972_v32 = vld [vmem:[%s5286_s15 + $0x88] sm:$0xff]  }
  0x16   : > { %v4973_v33 = vld [vmem:[%s5286_s15 + $0x90] sm:$0xff]   ;;  %v4974_v34 = vld [vmem:[%s5286_s15 + $0x98] sm:$0xff]   ;;  %v4975_v35 = vld [vmem:[%s5286_s15 + $0xa0] sm:$0xff]  }
  0x17   : > { %1194 = vmatpush1.bf16.msra.mxu1 %v4983_v16  ;;  %v4976_v36 = vld [vmem:[%s5286_s15 + $0xa8] sm:$0xff]   ;;  %v4978_v37 = vld [vmem:[%s5286_s15 + $0xb0] sm:$0xff]   ;;  %v4981_v38 = vld [vmem:[%s5286_s15 + $0xb8] sm:$0xff]   ;;  %s4131_s15 = sshll.u32 %s4125_s28, 1 }
  0x18   : > { %1195 = vmatprep.subr.bf16.mxu1 %v5215_v2  ;;  %p313_p4 = scmp.lt.s32.totalorder %s4131_s15, 3 }
  0x19   : > { %4163 = vmatmul.mubr.msk.bf16.gmra.mrb[4].mxu0 %vm526_vm0, %v4956_v4 }
  0x1a   : > { %651 = vmatprep.mubr.bf16.mxu0 %v5215_v2  ;;  %s6412_s15 = smov (!%p313_p4, %s4131_s15), 3 }
  0x1b   : > { %1196 = vmatpush1.bf16.msra.mxu1 %v4984_v17  ;;  %s4938_s25 = smul.u32 24, %s6412_s15  ;;  %s4134_s14 = sshll.u32 %s6412_s15, 3 }
  0x1c   : > { %1197 = vmatprep.subr.bf16.mxu1 %v5215_v2  ;;  %s323_s18 = scalar_lea.vmem %s6408_s8, %s4134_s14 }
  0x1d   : > { %s317_s29 = scalar_lea.vmem %s6407_s7, %s4938_s25 }
  0x1f   : > { %1198 = vmatpush1.bf16.msra.mxu1 %v4985_v18 }
  0x20   : > { %1199 = vmatprep.subr.bf16.mxu1 %v5215_v2 }
  0x21   : > { %4164 = vmatmul.mubr.msk.bf16.gmra.mrb[8].mxu0 %vm526_vm0, %v4957_v5 }
  0x22   : > { %661 = vmatprep.mubr.bf16.mxu0 %v5215_v2 }
  0x23   : > { %1200 = vmatpush1.bf16.msra.mxu1 %v4986_v20 }
  0x24   : > { %1201 = vmatprep.subr.bf16.mxu1 %v5215_v2 }
  0x27   : > { %1202 = vmatpush1.bf16.msra.mxu1 %v4987_v21 }
  0x28   : > { %1203 = vmatprep.subr.bf16.mxu1 %v5215_v2 }
  0x29   : > { %4165 = vmatmul.mubr.msk.bf16.gmra.mrb[12].mxu0 %vm526_vm0, %v4958_v6 }
  0x2a   : > { %671 = vmatprep.mubr.bf16.mxu0 %v5215_v2 }
  0x2b   : > { %1204 = vmatpush1.bf16.msra.mxu1 %v4988_v23 }
  0x2c   : > { %1205 = vmatprep.subr.bf16.mxu1 %v5215_v2 }
  0x2f   : > { %1206 = vmatpush1.bf16.msra.mxu1 %v4989_v25  ;;  %v4993_v25 = vld [vmem:[%s6403_s3 + $0x64] ss:$12 sps:$4 sm:$0xff]  }
  0x30   : > { %1207 = vmatprep.subr.bf16.mxu1 %v5215_v2  ;;  %1618 = vmatprep.subr.bf16.mxu0 %v4993_v25 }
  0x31   : > { %4166 = vmatmul.mubr.msk.bf16.gmra.mrb[16].mxu0 %vm526_vm0, %v4959_v7 }
  0x32   : > { %681 = vmatprep.mubr.bf16.mxu0 %v5215_v2 }
  0x33   : > { %1208 = vmatpush1.bf16.msra.mxu1 %v4990_v26 }
  0x39   : > { %4167 = vmatmul.mubr.msk.bf16.gmra.mrb[20].mxu0 %vm526_vm0, %v4960_v8 }
  0x3a   : > { %691 = vmatprep.mubr.bf16.mxu0 %v5215_v2 }
  0x41   : > { %4168 = vmatmul.mubr.msk.bf16.gmra.mrb[24].mxu0 %vm526_vm0, %v4961_v10 }
  0x42   : > { %701 = vmatprep.mubr.bf16.mxu0 %v5215_v2 }
  0x49   : > { %4169 = vmatmul.mubr.msk.bf16.gmra.mrb[28].mxu0 %vm526_vm0, %v4962_v13 }
  0x4a   : > { %711 = vmatprep.mubr.bf16.mxu0 %v5215_v2 }
  0x51   : > { %4170 = vmatmul.mubr.msk.bf16.gmra.mrb[32].mxu0 %vm526_vm0, %v4963_v15 }
  0x52   : > { %721 = vmatprep.mubr.bf16.mxu0 %v5215_v2 }
  0x59   : > { %4171 = vmatmul.mubr.msk.bf16.gmra.mrb[36].mxu0 %vm526_vm0, %v4964_v19 }
  0x5a   : > { %731 = vmatprep.mubr.bf16.mxu0 %v5215_v2 }
  0x61   : > { %4172 = vmatmul.mubr.msk.bf16.gmra.mrb[40].mxu0 %vm526_vm0, %v4965_v22 }
  0x62   : > { %741 = vmatprep.mubr.bf16.mxu0 %v5215_v2 }
  0x69   : > { %4173 = vmatmul.mubr.msk.bf16.gmra.mrb[44].mxu0 %vm526_vm0, %v4966_v24  ;;  %v4991_v24 = vld [vmem:[%s6403_s3 + $0x60] ss:$12 sps:$4 sm:$0xff]  }
  0x6a   : > { %751 = vmatprep.mubr.bf16.mxu0 %v5215_v2  ;;  %1619 = vmatpush1.bf16.msra.mxu0 %v4991_v24 }
  0x71   : > { %4174 = vmatmul.mubr.msk.bf16.gmra.mrb[48].mxu0 %vm526_vm0, %v4967_v27 }
  0x72   : > { %761 = vmatprep.mubr.bf16.mxu0 %v5215_v2 }
  0x79   : > { %4175 = vmatmul.mubr.msk.bf16.gmra.mrb[52].mxu0 %vm526_vm0, %v4968_v28 }
  0x7a   : > { %771 = vmatprep.mubr.bf16.mxu0 %v5215_v2 }
  0x81   : > { %4176 = vmatmul.mubr.msk.bf16.gmra.mrb[56].mxu0 %vm526_vm0, %v4969_v29 }
  0x82   : > { %781 = vmatprep.mubr.bf16.mxu0 %v5215_v2 }
  0x89   : > { %4177 = vmatmul.mubr.msk.bf16.gmra.mrb[60].mxu0 %vm526_vm0, %v4970_v30 }
  0x8a   : > { %791 = vmatprep.mubr.bf16.mxu0 %v5215_v2 }
  0x91   : > { %4178 = vmatmul.mubr.msk.bf16.gmra.mrb[64].mxu0 %vm526_vm0, %v4971_v31 }
  0x92   : > { %801 = vmatprep.mubr.bf16.mxu0 %v5215_v2 }
  0x99   : > { %4179 = vmatmul.mubr.msk.bf16.gmra.mrb[68].mxu0 %vm526_vm0, %v4972_v32 }
  0x9a   : > { %811 = vmatprep.mubr.bf16.mxu0 %v5215_v2 }
  0xa1   : > { %4180 = vmatmul.mubr.msk.bf16.gmra.mrb[72].mxu0 %vm526_vm0, %v4973_v33 }
  0xa2   : > { %821 = vmatprep.mubr.bf16.mxu0 %v5215_v2 }
  0xa9   : > { %4181 = vmatmul.mubr.msk.bf16.gmra.mrb[76].mxu0 %vm526_vm0, %v4974_v34 }
  0xaa   : > { %831 = vmatprep.mubr.bf16.mxu0 %v5215_v2 }
  0xb1   : > { %4182 = vmatmul.mubr.msk.bf16.gmra.mrb[80].mxu0 %vm526_vm0, %v4975_v35 }
  0xb2   : > { %841 = vmatprep.mubr.bf16.mxu0 %v5215_v2 }
  0xb9   : > { %4183 = vmatmul.mubr.msk.bf16.gmra.mrb[84].mxu0 %vm526_vm0, %v4976_v36 }
  0xba   : > { %851 = vmatprep.mubr.bf16.mxu0 %v5215_v2 }
  0xc1   : > { %4184 = vmatmul.mubr.msk.bf16.gmra.mrb[88].mxu0 %vm526_vm0, %v4978_v37 }
  0xc2   : > { %861 = vmatprep.mubr.bf16.mxu0 %v5215_v2 }
  0xc9   : > { %4185 = vmatmul.mubr.msk.bf16.gmra.mrb[92].mxu0 %vm526_vm0, %v4981_v38 }
  0xca   : > { %1650 = vmatprep.mubr.bf16.mxu0 %v5215_v2 }
  0xe4   : > { %v633_v46 = vpop.f32.mrb[0].mxu0 }
  0xe5   : > { %v634_v47 = vadd.f32 %v633_v46, %v5416_v44  ;;  %v635_v48 = vpop.f32.mrb[1].mxu0 }
  0xe6   : > { %v636_v49 = vadd.f32 %v635_v48, %v5420_v45  ;;  %v637_v50 = vpop.f32.mrb[2].mxu0 }
  0xe7   : > { %v638_v51 = vadd.f32 %v637_v50, %v5416_v44  ;;  %v639_v52 = vpop.f32.mrb[3].mxu0  ;;  %v872_v54 = vmax.f32 %v634_v47, 0.0 }
  0xe8   : > { %v640_v53 = vadd.f32 %v639_v52, %v5420_v45  ;;  %v873_v56 = vmax.f32 %v636_v49, 0.0 }
  0xe9   : > { %v874_v55 = vmax.f32 %v638_v51, 0.0 }
  0xea   : > { %v875_v57 = vmax.f32 %v640_v53, 0.0 }
  0xeb   : > { %v968_v58 = vpack.c.bf16 %v874_v55, %v872_v54 }
  0xec   : > { %v643_v59 = vpop.f32.mrb[4].mxu0  ;;  %v969_v60 = vpack.c.bf16 %v875_v57, %v873_v56 }
  0xed   : > { %v644_v61 = vadd.f32 %v643_v59, %v5416_v44  ;;  %v645_v62 = vpop.f32.mrb[5].mxu0 }
  0xee   : > { %v646_v63 = vadd.f32 %v645_v62, %v5420_v45  ;;  %v647_v0 = vpop.f32.mrb[6].mxu0  ;;  %4198 = vmatprep.mubr.msk.bf16.mxu1 %vm1112_vm1, %v969_v60 }
  0xef   : > { %v648_v1 = vadd.f32 %v647_v0, %v5416_v44  ;;  %v649_v3 = vpop.f32.mrb[7].mxu0  ;;  %1218 = vmatmul.mubr.bf16.vlgmr.msra.gmra.mrb[0].mxu1 %v968_v58  ;;  %v876_v5 = vmax.f32 %v644_v61, 0.0 }
  0xf0   : > { %v650_v4 = vadd.f32 %v649_v3, %v5420_v45  ;;  %v877_v7 = vmax.f32 %v646_v63, 0.0 }
  0xf1   : > { %v878_v6 = vmax.f32 %v648_v1, 0.0 }
  0xf2   : > { %v879_v8 = vmax.f32 %v650_v4, 0.0 }
  0xf3   : > { %v970_v9 = vpack.c.bf16 %v878_v6, %v876_v5 }
  0xf4   : > { %v971_v10 = vpack.c.bf16 %v879_v8, %v877_v7  ;;  %v653_v11 = vpop.f32.mrb[8].mxu0 }
  0xf5   : > { %v654_v12 = vadd.f32 %v653_v11, %v5416_v44  ;;  %v655_v13 = vpop.f32.mrb[9].mxu0 }
  0xf6   : > { %v656_v14 = vadd.f32 %v655_v13, %v5420_v45  ;;  %v657_v15 = vpop.f32.mrb[10].mxu0  ;;  %4199 = vmatprep.mubr.msk.bf16.mxu1 %vm1112_vm1, %v971_v10 }
  0xf7   : > { %v658_v16 = vadd.f32 %v657_v15, %v5416_v44  ;;  %v659_v17 = vpop.f32.mrb[11].mxu0  ;;  %1226 = vmatmul.mubr.bf16.gmra.mrb[4].mxu1 %v970_v9  ;;  %v880_v19 = vmax.f32 %v654_v12, 0.0 }
  0xf8   : > { %v660_v18 = vadd.f32 %v659_v17, %v5420_v45  ;;  %v881_v21 = vmax.f32 %v656_v14, 0.0 }
  0xf9   : > { %v882_v20 = vmax.f32 %v658_v16, 0.0 }
  0xfa   : > { %v883_v22 = vmax.f32 %v660_v18, 0.0 }
  0xfb   : > { %v972_v23 = vpack.c.bf16 %v882_v20, %v880_v19 }
  0xfc   : > { %v973_v26 = vpack.c.bf16 %v883_v22, %v881_v21  ;;  %v663_v27 = vpop.f32.mrb[12].mxu0 }
  0xfd   : > { %v664_v28 = vadd.f32 %v663_v27, %v5416_v44  ;;  %v665_v29 = vpop.f32.mrb[13].mxu0 }
  0xfe   : > { %v666_v30 = vadd.f32 %v665_v29, %v5420_v45  ;;  %v667_v31 = vpop.f32.mrb[14].mxu0  ;;  %4200 = vmatprep.mubr.msk.bf16.mxu1 %vm1112_vm1, %v973_v26 }
  0xff   : > { %v668_v32 = vadd.f32 %v667_v31, %v5416_v44  ;;  %v669_v33 = vpop.f32.mrb[15].mxu0  ;;  %1234 = vmatmul.mubr.bf16.gmra.mrb[8].mxu1 %v972_v23  ;;  %v884_v35 = vmax.f32 %v664_v28, 0.0  ;;  %v5216_v28 = vmov 0.0  }
 0x100   : > { %v670_v34 = vadd.f32 %v669_v33, %v5420_v45  ;;  %v885_v37 = vmax.f32 %v666_v30, 0.0  ;;  %4707 = vmatprep.subr.bf16.mxu1 %v5216_v28  ;;  %v4994_v33 = vld [vmem:[%s6403_s3 + $0x8] ss:$12 sps:$4 sm:$0xff]  }
 0x101   : > { %v886_v36 = vmax.f32 %v668_v32, 0.0  ;;  %4708 = vmatpush3.bf16.msra.mxu1 %v4994_v33 }
 0x102   : > { %v887_v38 = vmax.f32 %v670_v34, 0.0  ;;  %4709 = vmatprep.subr.bf16.mxu1 %v5216_v28 }
 0x103   : > { %v974_v39 = vpack.c.bf16 %v886_v36, %v884_v35 }
 0x104   : > { %v975_v42 = vpack.c.bf16 %v887_v38, %v885_v37  ;;  %v673_v46 = vpop.f32.mrb[16].mxu0 }
 0x105   : > { %v674_v47 = vadd.f32 %v673_v46, %v5416_v44  ;;  %v675_v48 = vpop.f32.mrb[17].mxu0 }
 0x106   : > { %v676_v49 = vadd.f32 %v675_v48, %v5420_v45  ;;  %v677_v50 = vpop.f32.mrb[18].mxu0  ;;  %4201 = vmatprep.mubr.msk.bf16.mxu1 %vm1112_vm1, %v975_v42 }
 0x107   : > { %v678_v51 = vadd.f32 %v677_v50, %v5416_v44  ;;  %v679_v52 = vpop.f32.mrb[19].mxu0  ;;  %1242 = vmatmul.mubr.bf16.gmra.mrb[12].mxu1 %v974_v39  ;;  %v888_v54 = vmax.f32 %v674_v47, 0.0 }
 0x108   : > { %v680_v53 = vadd.f32 %v679_v52, %v5420_v45  ;;  %v889_v56 = vmax.f32 %v676_v49, 0.0  ;;  %v4997_v52 = vld [vmem:[%s6403_s3 + $0x7c] ss:$12 sps:$4 sm:$0xff]  }
 0x109   : > { %v890_v55 = vmax.f32 %v678_v51, 0.0  ;;  %v4995_v51 = vld [vmem:[%s6403_s3 + $0x78] ss:$12 sps:$4 sm:$0xff]   ;;  %1620 = vmatprep.subr.bf16.mxu0 %v4997_v52 }
 0x10a   : > { %v891_v57 = vmax.f32 %v680_v53, 0.0  ;;  %1621 = vmatpush1.bf16.msra.mxu0 %v4995_v51 }
 0x10b   : > { %v976_v58 = vpack.c.bf16 %v890_v55, %v888_v54 }
 0x10c   : > { %v977_v59 = vpack.c.bf16 %v891_v57, %v889_v56  ;;  %v683_v60 = vpop.f32.mrb[20].mxu0 }
 0x10d   : > { %v684_v61 = vadd.f32 %v683_v60, %v5416_v44  ;;  %v685_v62 = vpop.f32.mrb[21].mxu0 }
 0x10e   : > { %v686_v63 = vadd.f32 %v685_v62, %v5420_v45  ;;  %v687_v0 = vpop.f32.mrb[22].mxu0  ;;  %4202 = vmatprep.mubr.msk.bf16.mxu1 %vm1112_vm1, %v977_v59 }
 0x10f   : > { %v688_v1 = vadd.f32 %v687_v0, %v5416_v44  ;;  %v689_v3 = vpop.f32.mrb[23].mxu0  ;;  %1250 = vmatmul.mubr.bf16.gmra.mrb[16].mxu1 %v976_v58  ;;  %v892_v5 = vmax.f32 %v684_v61, 0.0 }
 0x110   : > { %v690_v4 = vadd.f32 %v689_v3, %v5420_v45  ;;  %v893_v7 = vmax.f32 %v686_v63, 0.0 }
 0x111   : > { %v894_v6 = vmax.f32 %v688_v1, 0.0 }
 0x112   : > { %v895_v8 = vmax.f32 %v690_v4, 0.0 }
 0x113   : > { %v978_v9 = vpack.c.bf16 %v894_v6, %v892_v5 }
 0x114   : > { %v979_v10 = vpack.c.bf16 %v895_v8, %v893_v7  ;;  %v693_v11 = vpop.f32.mrb[24].mxu0 }
 0x115   : > { %v694_v12 = vadd.f32 %v693_v11, %v5416_v44  ;;  %v695_v13 = vpop.f32.mrb[25].mxu0 }
 0x116   : > { %v696_v14 = vadd.f32 %v695_v13, %v5420_v45  ;;  %v697_v15 = vpop.f32.mrb[26].mxu0  ;;  %4203 = vmatprep.mubr.msk.bf16.mxu1 %vm1112_vm1, %v979_v10 }
 0x117   : > { %v698_v16 = vadd.f32 %v697_v15, %v5416_v44  ;;  %v699_v17 = vpop.f32.mrb[27].mxu0  ;;  %1258 = vmatmul.mubr.bf16.gmra.mrb[20].mxu1 %v978_v9  ;;  %v896_v19 = vmax.f32 %v694_v12, 0.0 }
 0x118   : > { %v700_v18 = vadd.f32 %v699_v17, %v5420_v45  ;;  %v897_v21 = vmax.f32 %v696_v14, 0.0 }
 0x119   : > { %v898_v20 = vmax.f32 %v698_v16, 0.0 }
 0x11a   : > { %v899_v22 = vmax.f32 %v700_v18, 0.0 }
 0x11b   : > { %v980_v23 = vpack.c.bf16 %v898_v20, %v896_v19 }
 0x11c   : > { %v981_v24 = vpack.c.bf16 %v899_v22, %v897_v21  ;;  %v703_v25 = vpop.f32.mrb[28].mxu0 }
 0x11d   : > { %v704_v26 = vadd.f32 %v703_v25, %v5416_v44  ;;  %v705_v27 = vpop.f32.mrb[29].mxu0 }
 0x11e   : > { %v706_v29 = vadd.f32 %v705_v27, %v5420_v45  ;;  %v707_v30 = vpop.f32.mrb[30].mxu0  ;;  %4204 = vmatprep.mubr.msk.bf16.mxu1 %vm1112_vm1, %v981_v24 }
 0x11f   : > { %v708_v31 = vadd.f32 %v707_v30, %v5416_v44  ;;  %v709_v32 = vpop.f32.mrb[31].mxu0  ;;  %1266 = vmatmul.mubr.bf16.gmra.mrb[24].mxu1 %v980_v23  ;;  %v900_v35 = vmax.f32 %v704_v26, 0.0 }
 0x120   : > { %v710_v34 = vadd.f32 %v709_v32, %v5420_v45  ;;  %v901_v37 = vmax.f32 %v706_v29, 0.0 }
 0x121   : > { %v902_v36 = vmax.f32 %v708_v31, 0.0 }
 0x122   : > { %v903_v38 = vmax.f32 %v710_v34, 0.0 }
 0x123   : > { %v982_v39 = vpack.c.bf16 %v902_v36, %v900_v35 }
 0x124   : > { %v983_v42 = vpack.c.bf16 %v903_v38, %v901_v37  ;;  %v713_v46 = vpop.f32.mrb[32].mxu0 }
 0x125   : > { %v714_v47 = vadd.f32 %v713_v46, %v5416_v44  ;;  %v715_v48 = vpop.f32.mrb[33].mxu0 }
 0x126   : > { %v716_v49 = vadd.f32 %v715_v48, %v5420_v45  ;;  %v717_v50 = vpop.f32.mrb[34].mxu0  ;;  %4205 = vmatprep.mubr.msk.bf16.mxu1 %vm1112_vm1, %v983_v42 }
 0x127   : > { %v718_v53 = vadd.f32 %v717_v50, %v5416_v44  ;;  %v719_v54 = vpop.f32.mrb[35].mxu0  ;;  %1274 = vmatmul.mubr.bf16.gmra.mrb[28].mxu1 %v982_v39  ;;  %v904_v56 = vmax.f32 %v714_v47, 0.0 }
 0x128   : > { %v720_v55 = vadd.f32 %v719_v54, %v5420_v45  ;;  %v905_v58 = vmax.f32 %v716_v49, 0.0 }
 0x129   : > { %v906_v57 = vmax.f32 %v718_v53, 0.0 }
 0x12a   : > { %v907_v59 = vmax.f32 %v720_v55, 0.0 }
 0x12b   : > { %v984_v60 = vpack.c.bf16 %v906_v57, %v904_v56 }
 0x12c   : > { %v985_v61 = vpack.c.bf16 %v907_v59, %v905_v58  ;;  %v723_v62 = vpop.f32.mrb[36].mxu0 }
 0x12d   : > { %v724_v63 = vadd.f32 %v723_v62, %v5416_v44  ;;  %v725_v0 = vpop.f32.mrb[37].mxu0  ;;  %v4998_v62 = vld [vmem:[%s6403_s3 + $0x20] ss:$12 sps:$4 sm:$0xff]  }
 0x12e   : > { %v726_v1 = vadd.f32 %v725_v0, %v5420_v45  ;;  %v727_v3 = vpop.f32.mrb[38].mxu0  ;;  %4206 = vmatprep.mubr.msk.bf16.mxu1 %vm1112_vm1, %v985_v61  ;;  %4710 = vmatpush3.bf16.msra.mxu1 %v4998_v62 }
 0x12f   : > { %v728_v4 = vadd.f32 %v727_v3, %v5416_v44  ;;  %v729_v5 = vpop.f32.mrb[39].mxu0  ;;  %1282 = vmatmul.mubr.bf16.gmra.mrb[32].mxu1 %v984_v60  ;;  %v908_v7 = vmax.f32 %v724_v63, 0.0  ;;  %4711 = vmatprep.subr.bf16.mxu1 %v5216_v28 }
 0x130   : > { %v730_v6 = vadd.f32 %v729_v5, %v5420_v45  ;;  %v909_v9 = vmax.f32 %v726_v1, 0.0 }
 0x131   : > { %v910_v8 = vmax.f32 %v728_v4, 0.0 }
 0x132   : > { %v911_v10 = vmax.f32 %v730_v6, 0.0 }
 0x133   : > { %v986_v11 = vpack.c.bf16 %v910_v8, %v908_v7 }
 0x134   : > { %v987_v12 = vpack.c.bf16 %v911_v10, %v909_v9  ;;  %v733_v13 = vpop.f32.mrb[40].mxu0 }
 0x135   : > { %v734_v14 = vadd.f32 %v733_v13, %v5416_v44  ;;  %v735_v15 = vpop.f32.mrb[41].mxu0 }
 0x136   : > { %v736_v16 = vadd.f32 %v735_v15, %v5420_v45  ;;  %v737_v17 = vpop.f32.mrb[42].mxu0  ;;  %4207 = vmatprep.mubr.msk.bf16.mxu1 %vm1112_vm1, %v987_v12 }
 0x137   : > { %v738_v18 = vadd.f32 %v737_v17, %v5416_v44  ;;  %v739_v19 = vpop.f32.mrb[43].mxu0  ;;  %1290 = vmatmul.mubr.bf16.gmra.mrb[36].mxu1 %v986_v11  ;;  %v912_v21 = vmax.f32 %v734_v14, 0.0  ;;  %v5001_v17 = vld [vmem:[%s6403_s3 + $0x94] ss:$12 sps:$4 sm:$0xff]  }
 0x138   : > { %v740_v20 = vadd.f32 %v739_v19, %v5420_v45  ;;  %v913_v23 = vmax.f32 %v736_v16, 0.0  ;;  %v4999_v16 = vld [vmem:[%s6403_s3 + $0x90] ss:$12 sps:$4 sm:$0xff]   ;;  %1622 = vmatprep.subr.bf16.mxu0 %v5001_v17 }
 0x139   : > { %v914_v22 = vmax.f32 %v738_v18, 0.0  ;;  %1623 = vmatpush1.bf16.msra.mxu0 %v4999_v16 }
 0x13a   : > { %v915_v24 = vmax.f32 %v740_v20, 0.0 }
 0x13b   : > { %v988_v25 = vpack.c.bf16 %v914_v22, %v912_v21 }
 0x13c   : > { %v989_v26 = vpack.c.bf16 %v915_v24, %v913_v23  ;;  %v743_v27 = vpop.f32.mrb[44].mxu0 }
 0x13d   : > { %v744_v29 = vadd.f32 %v743_v27, %v5416_v44  ;;  %v745_v30 = vpop.f32.mrb[45].mxu0 }
 0x13e   : > { %v746_v31 = vadd.f32 %v745_v30, %v5420_v45  ;;  %v747_v32 = vpop.f32.mrb[46].mxu0  ;;  %4208 = vmatprep.mubr.msk.bf16.mxu1 %vm1112_vm1, %v989_v26 }
 0x13f   : > { %v748_v33 = vadd.f32 %v747_v32, %v5416_v44  ;;  %v749_v34 = vpop.f32.mrb[47].mxu0  ;;  %1298 = vmatmul.mubr.bf16.gmra.mrb[40].mxu1 %v988_v25  ;;  %v916_v36 = vmax.f32 %v744_v29, 0.0 }
 0x140   : > { %v750_v35 = vadd.f32 %v749_v34, %v5420_v45  ;;  %v917_v38 = vmax.f32 %v746_v31, 0.0 }
 0x141   : > { %v918_v37 = vmax.f32 %v748_v33, 0.0 }
 0x142   : > { %v919_v39 = vmax.f32 %v750_v35, 0.0 }
 0x143   : > { %v990_v42 = vpack.c.bf16 %v918_v37, %v916_v36 }
 0x144   : > { %v991_v46 = vpack.c.bf16 %v919_v39, %v917_v38  ;;  %v753_v47 = vpop.f32.mrb[48].mxu0 }
 0x145   : > { %v754_v48 = vadd.f32 %v753_v47, %v5416_v44  ;;  %v755_v49 = vpop.f32.mrb[49].mxu0 }
 0x146   : > { %v756_v50 = vadd.f32 %v755_v49, %v5420_v45  ;;  %v757_v51 = vpop.f32.mrb[50].mxu0  ;;  %4209 = vmatprep.mubr.msk.bf16.mxu1 %vm1112_vm1, %v991_v46 }
 0x147   : > { %v758_v52 = vadd.f32 %v757_v51, %v5416_v44  ;;  %v759_v53 = vpop.f32.mrb[51].mxu0  ;;  %1306 = vmatmul.mubr.bf16.gmra.mrb[44].mxu1 %v990_v42  ;;  %v920_v55 = vmax.f32 %v754_v48, 0.0 }
 0x148   : > { %v760_v54 = vadd.f32 %v759_v53, %v5420_v45  ;;  %v921_v57 = vmax.f32 %v756_v50, 0.0 }
 0x149   : > { %v922_v56 = vmax.f32 %v758_v52, 0.0 }
 0x14a   : > { %v923_v58 = vmax.f32 %v760_v54, 0.0 }
 0x14b   : > { %v992_v59 = vpack.c.bf16 %v922_v56, %v920_v55 }
 0x14c   : > { %v993_v60 = vpack.c.bf16 %v923_v58, %v921_v57  ;;  %v763_v61 = vpop.f32.mrb[52].mxu0 }
 0x14d   : > { %v764_v63 = vadd.f32 %v763_v61, %v5416_v44  ;;  %v765_v0 = vpop.f32.mrb[53].mxu0 }
 0x14e   : > { %v766_v1 = vadd.f32 %v765_v0, %v5420_v45  ;;  %v767_v3 = vpop.f32.mrb[54].mxu0  ;;  %4210 = vmatprep.mubr.msk.bf16.mxu1 %vm1112_vm1, %v993_v60 }
 0x14f   : > { %v768_v4 = vadd.f32 %v767_v3, %v5416_v44  ;;  %v769_v5 = vpop.f32.mrb[55].mxu0  ;;  %1314 = vmatmul.mubr.bf16.gmra.mrb[48].mxu1 %v992_v59  ;;  %v924_v7 = vmax.f32 %v764_v63, 0.0 }
 0x150   : > { %v770_v6 = vadd.f32 %v769_v5, %v5420_v45  ;;  %v925_v9 = vmax.f32 %v766_v1, 0.0 }
 0x151   : > { %v926_v8 = vmax.f32 %v768_v4, 0.0 }
 0x152   : > { %v927_v10 = vmax.f32 %v770_v6, 0.0 }
 0x153   : > { %v994_v11 = vpack.c.bf16 %v926_v8, %v924_v7 }
 0x154   : > { %v995_v12 = vpack.c.bf16 %v927_v10, %v925_v9  ;;  %v773_v13 = vpop.f32.mrb[56].mxu0 }
 0x155   : > { %v774_v14 = vadd.f32 %v773_v13, %v5416_v44  ;;  %v775_v15 = vpop.f32.mrb[57].mxu0 }
 0x156   : > { %v776_v18 = vadd.f32 %v775_v15, %v5420_v45  ;;  %v777_v19 = vpop.f32.mrb[58].mxu0  ;;  %4211 = vmatprep.mubr.msk.bf16.mxu1 %vm1112_vm1, %v995_v12 }
 0x157   : > { %v928_v20 = vmax.f32 %v774_v14, 0.0  ;;  %v778_v21 = vadd.f32 %v777_v19, %v5416_v44  ;;  %v779_v22 = vpop.f32.mrb[59].mxu0  ;;  %1322 = vmatmul.mubr.bf16.gmra.mrb[52].mxu1 %v994_v11 }
 0x158   : > { %v929_v23 = vmax.f32 %v776_v18, 0.0  ;;  %v780_v24 = vadd.f32 %v779_v22, %v5420_v45 }
 0x159   : > { %v930_v25 = vmax.f32 %v778_v21, 0.0 }
 0x15a   : > { %v931_v26 = vmax.f32 %v780_v24, 0.0 }
 0x15b   : > { %v996_v27 = vpack.c.bf16 %v930_v25, %v928_v20 }
 0x15c   : > { %v997_v29 = vpack.c.bf16 %v931_v26, %v929_v23  ;;  %v783_v30 = vpop.f32.mrb[60].mxu0 }
 0x15d   : > { %v784_v31 = vadd.f32 %v783_v30, %v5416_v44  ;;  %v785_v32 = vpop.f32.mrb[61].mxu0  ;;  %v5002_v30 = vld [vmem:[%s6403_s3 + $0x38] ss:$12 sps:$4 sm:$0xff]  }
 0x15e   : > { %v786_v33 = vadd.f32 %v785_v32, %v5420_v45  ;;  %v787_v34 = vpop.f32.mrb[62].mxu0  ;;  %4212 = vmatprep.mubr.msk.bf16.mxu1 %vm1112_vm1, %v997_v29  ;;  %4712 = vmatpush3.bf16.msra.mxu1 %v5002_v30 }
 0x15f   : > { %v932_v35 = vmax.f32 %v784_v31, 0.0  ;;  %v788_v36 = vadd.f32 %v787_v34, %v5416_v44  ;;  %v789_v37 = vpop.f32.mrb[63].mxu0  ;;  %1330 = vmatmul.mubr.bf16.gmra.mrb[56].mxu1 %v996_v27  ;;  %4713 = vmatprep.subr.bf16.mxu1 %v5216_v28 }
 0x160   : > { %v933_v38 = vmax.f32 %v786_v33, 0.0  ;;  %v790_v39 = vadd.f32 %v789_v37, %v5420_v45 }
 0x161   : > { %v934_v42 = vmax.f32 %v788_v36, 0.0 }
 0x162   : > { %v935_v46 = vmax.f32 %v790_v39, 0.0 }
 0x163   : > { %v998_v47 = vpack.c.bf16 %v934_v42, %v932_v35 }
 0x164   : > { %v999_v48 = vpack.c.bf16 %v935_v46, %v933_v38  ;;  %v793_v49 = vpop.f32.mrb[64].mxu0 }
 0x165   : > { %v794_v50 = vadd.f32 %v793_v49, %v5416_v44  ;;  %v795_v51 = vpop.f32.mrb[65].mxu0 }
 0x166   : > { %v796_v52 = vadd.f32 %v795_v51, %v5420_v45  ;;  %v797_v53 = vpop.f32.mrb[66].mxu0  ;;  %4213 = vmatprep.mubr.msk.bf16.mxu1 %vm1112_vm1, %v999_v48 }
 0x167   : > { %v936_v54 = vmax.f32 %v794_v50, 0.0  ;;  %v798_v55 = vadd.f32 %v797_v53, %v5416_v44  ;;  %v799_v56 = vpop.f32.mrb[67].mxu0  ;;  %1338 = vmatmul.mubr.bf16.gmra.mrb[60].mxu1 %v998_v47  ;;  %v5005_v53 = vld [vmem:[%s6403_s3 + $0xac] ss:$12 sps:$4 sm:$0xff]  }
 0x168   : > { %v937_v57 = vmax.f32 %v796_v52, 0.0  ;;  %v800_v58 = vadd.f32 %v799_v56, %v5420_v45  ;;  %v5003_v52 = vld [vmem:[%s6403_s3 + $0xa8] ss:$12 sps:$4 sm:$0xff]   ;;  %1624 = vmatprep.subr.bf16.mxu0 %v5005_v53 }
 0x169   : > { %v938_v59 = vmax.f32 %v798_v55, 0.0  ;;  %1625 = vmatpush1.bf16.msra.mxu0 %v5003_v52 }
 0x16a   : > { %v939_v60 = vmax.f32 %v800_v58, 0.0  ;;  %4695 = vmatprep.subr.bf16.mxu0 %v5216_v28 }
 0x16b   : > { %v1000_v61 = vpack.c.bf16 %v938_v59, %v936_v54 }
 0x16c   : > { %v1001_v62 = vpack.c.bf16 %v939_v60, %v937_v57  ;;  %v803_v63 = vpop.f32.mrb[68].mxu0 }
 0x16d   : > { %v804_v0 = vadd.f32 %v803_v63, %v5416_v44  ;;  %v805_v1 = vpop.f32.mrb[69].mxu0 }
 0x16e   : > { %v806_v3 = vadd.f32 %v805_v1, %v5420_v45  ;;  %v807_v4 = vpop.f32.mrb[70].mxu0  ;;  %4214 = vmatprep.mubr.msk.bf16.mxu1 %vm1112_vm1, %v1001_v62 }
 0x16f   : > { %v940_v5 = vmax.f32 %v804_v0, 0.0  ;;  %v808_v6 = vadd.f32 %v807_v4, %v5416_v44  ;;  %v809_v7 = vpop.f32.mrb[71].mxu0  ;;  %1346 = vmatmul.mubr.bf16.gmra.mrb[64].mxu1 %v1000_v61 }
 0x170   : > { %v941_v8 = vmax.f32 %v806_v3, 0.0  ;;  %v810_v9 = vadd.f32 %v809_v7, %v5420_v45 }
 0x171   : > { %v942_v10 = vmax.f32 %v808_v6, 0.0 }
 0x172   : > { %v943_v11 = vmax.f32 %v810_v9, 0.0 }
 0x173   : > { %v1002_v12 = vpack.c.bf16 %v942_v10, %v940_v5 }
 0x174   : > { %v1003_v13 = vpack.c.bf16 %v943_v11, %v941_v8  ;;  %v813_v14 = vpop.f32.mrb[72].mxu0 }
 0x175   : > { %v814_v15 = vadd.f32 %v813_v14, %v5416_v44  ;;  %v815_v16 = vpop.f32.mrb[73].mxu0 }
 0x176   : > { %v816_v17 = vadd.f32 %v815_v16, %v5420_v45  ;;  %v817_v18 = vpop.f32.mrb[74].mxu0  ;;  %4215 = vmatprep.mubr.msk.bf16.mxu1 %vm1112_vm1, %v1003_v13 }
 0x177   : > { %v944_v19 = vmax.f32 %v814_v15, 0.0  ;;  %v818_v20 = vadd.f32 %v817_v18, %v5416_v44  ;;  %v819_v21 = vpop.f32.mrb[75].mxu0  ;;  %1354 = vmatmul.mubr.bf16.gmra.mrb[68].mxu1 %v1002_v12 }
 0x178   : > { %v945_v22 = vmax.f32 %v816_v17, 0.0  ;;  %v820_v23 = vadd.f32 %v819_v21, %v5420_v45 }
 0x179   : > { %v946_v24 = vmax.f32 %v818_v20, 0.0 }
 0x17a   : > { %v947_v25 = vmax.f32 %v820_v23, 0.0 }
 0x17b   : > { %v1004_v26 = vpack.c.bf16 %v946_v24, %v944_v19 }
 0x17c   : > { %v1005_v27 = vpack.c.bf16 %v947_v25, %v945_v22  ;;  %v823_v29 = vpop.f32.mrb[76].mxu0 }
 0x17d   : > { %v824_v31 = vadd.f32 %v823_v29, %v5416_v44  ;;  %v825_v32 = vpop.f32.mrb[77].mxu0 }
 0x17e   : > { %v826_v33 = vadd.f32 %v825_v32, %v5420_v45  ;;  %v827_v34 = vpop.f32.mrb[78].mxu0  ;;  %4216 = vmatprep.mubr.msk.bf16.mxu1 %vm1112_vm1, %v1005_v27 }
 0x17f   : > { %v948_v35 = vmax.f32 %v824_v31, 0.0  ;;  %v828_v36 = vadd.f32 %v827_v34, %v5416_v44  ;;  %v829_v37 = vpop.f32.mrb[79].mxu0  ;;  %1362 = vmatmul.mubr.bf16.gmra.mrb[72].mxu1 %v1004_v26 }
 0x180   : > { %v949_v38 = vmax.f32 %v826_v33, 0.0  ;;  %v830_v39 = vadd.f32 %v829_v37, %v5420_v45 }
 0x181   : > { %v950_v42 = vmax.f32 %v828_v36, 0.0 }
 0x182   : > { %v951_v46 = vmax.f32 %v830_v39, 0.0 }
 0x183   : > { %v1006_v47 = vpack.c.bf16 %v950_v42, %v948_v35 }
 0x184   : > { %v1007_v48 = vpack.c.bf16 %v951_v46, %v949_v38  ;;  %v833_v49 = vpop.f32.mrb[80].mxu0 }
 0x185   : > { %v834_v50 = vadd.f32 %v833_v49, %v5416_v44  ;;  %v835_v51 = vpop.f32.mrb[81].mxu0 }
 0x186   : > { %v836_v54 = vadd.f32 %v835_v51, %v5420_v45  ;;  %v837_v55 = vpop.f32.mrb[82].mxu0  ;;  %4217 = vmatprep.mubr.msk.bf16.mxu1 %vm1112_vm1, %v1007_v48 }
 0x187   : > { %v952_v56 = vmax.f32 %v834_v50, 0.0  ;;  %v838_v57 = vadd.f32 %v837_v55, %v5416_v44  ;;  %v839_v58 = vpop.f32.mrb[83].mxu0  ;;  %1370 = vmatmul.mubr.bf16.gmra.mrb[76].mxu1 %v1006_v47  ;;  %v5006_v50 = vld [vmem:[%s6403_s3 + $0x50] ss:$12 sps:$4 sm:$0xff]  }
 0x188   : > { %v953_v59 = vmax.f32 %v836_v54, 0.0  ;;  %v840_v60 = vadd.f32 %v839_v58, %v5420_v45  ;;  %4714 = vmatpush3.bf16.msra.mxu1 %v5006_v50 }
 0x189   : > { %v954_v61 = vmax.f32 %v838_v57, 0.0  ;;  %4719 = vmatprep.subr.bf16.mxu1 %v5216_v28 }
 0x18a   : > { %v955_v62 = vmax.f32 %v840_v60, 0.0 }
 0x18b   : > { %v1008_v63 = vpack.c.bf16 %v954_v61, %v952_v56 }
 0x18c   : > { %v1009_v0 = vpack.c.bf16 %v955_v62, %v953_v59  ;;  %v843_v1 = vpop.f32.mrb[84].mxu0 }
 0x18d   : > { %v844_v3 = vadd.f32 %v843_v1, %v5416_v44  ;;  %v845_v4 = vpop.f32.mrb[85].mxu0 }
 0x18e   : > { %v846_v5 = vadd.f32 %v845_v4, %v5420_v45  ;;  %v847_v6 = vpop.f32.mrb[86].mxu0  ;;  %4218 = vmatprep.mubr.msk.bf16.mxu1 %vm1112_vm1, %v1009_v0 }
 0x18f   : > { %v956_v7 = vmax.f32 %v844_v3, 0.0  ;;  %v848_v8 = vadd.f32 %v847_v6, %v5416_v44  ;;  %v849_v9 = vpop.f32.mrb[87].mxu0  ;;  %1378 = vmatmul.mubr.bf16.gmra.mrb[80].mxu1 %v1008_v63 }
 0x190   : > { %v957_v10 = vmax.f32 %v846_v5, 0.0  ;;  %v850_v11 = vadd.f32 %v849_v9, %v5420_v45 }
 0x191   : > { %v958_v12 = vmax.f32 %v848_v8, 0.0 }
 0x192   : > { %v959_v13 = vmax.f32 %v850_v11, 0.0 }
 0x193   : > { %v1010_v14 = vpack.c.bf16 %v958_v12, %v956_v7 }
 0x194   : > { %v1011_v15 = vpack.c.bf16 %v959_v13, %v957_v10  ;;  %v853_v16 = vpop.f32.mrb[88].mxu0 }
 0x195   : > { %v854_v17 = vadd.f32 %v853_v16, %v5416_v44  ;;  %v855_v18 = vpop.f32.mrb[89].mxu0 }
 0x196   : > { %v856_v19 = vadd.f32 %v855_v18, %v5420_v45  ;;  %v857_v20 = vpop.f32.mrb[90].mxu0  ;;  %4219 = vmatprep.mubr.msk.bf16.mxu1 %vm1112_vm1, %v1011_v15 }
 0x197   : > { %v960_v21 = vmax.f32 %v854_v17, 0.0  ;;  %v858_v22 = vadd.f32 %v857_v20, %v5416_v44  ;;  %v859_v23 = vpop.f32.mrb[91].mxu0  ;;  %1386 = vmatmul.mubr.bf16.gmra.mrb[84].mxu1 %v1010_v14 }
 0x198   : > { %v961_v24 = vmax.f32 %v856_v19, 0.0  ;;  %v860_v25 = vadd.f32 %v859_v23, %v5420_v45 }
 0x199   : > { %v962_v26 = vmax.f32 %v858_v22, 0.0 }
 0x19a   : > { %v963_v27 = vmax.f32 %v860_v25, 0.0 }
 0x19b   : > { %v1012_v29 = vpack.c.bf16 %v962_v26, %v960_v21 }
 0x19c   : > { %v1013_v30 = vpack.c.bf16 %v963_v27, %v961_v24  ;;  %v863_v31 = vpop.f32.mrb[92].mxu0 }
 0x19d   : > { %v864_v32 = vadd.f32 %v863_v31, %v5416_v44  ;;  %v865_v33 = vpop.f32.mrb[93].mxu0 }
 0x19e   : > { %v866_v34 = vadd.f32 %v865_v33, %v5420_v45  ;;  %v867_v35 = vpop.f32.mrb[94].mxu0  ;;  %4220 = vmatprep.mubr.msk.bf16.mxu1 %vm1112_vm1, %v1013_v30 }
 0x19f   : > { %v964_v36 = vmax.f32 %v864_v32, 0.0  ;;  %v868_v37 = vadd.f32 %v867_v35, %v5416_v44  ;;  %v869_v38 = vpop.f32.mrb[95].mxu0  ;;  %1394 = vmatmul.mubr.bf16.gmra.mrb[88].mxu1 %v1012_v29  ;;  %v5633_v35 = vld [vmem:[%s6406_s6 + $0x1] ss:$0 sm:$0xff] }
 0x1a0   : > { %v965_v39 = vmax.f32 %v866_v34, 0.0  ;;  %v870_v42 = vadd.f32 %v869_v38, %v5420_v45 }
 0x1a1   : > { %v966_v46 = vmax.f32 %v868_v37, 0.0 }
 0x1a2   : > { %v967_v47 = vmax.f32 %v870_v42, 0.0 }
 0x1a3   : > { %v1014_v48 = vpack.c.bf16 %v966_v46, %v964_v36 }
 0x1a4   : > { %v1015_v49 = vpack.c.bf16 %v967_v47, %v965_v39  ;;  %v5638_v39 = vld [vmem:[%s6406_s6 + $0x2] ss:$0 sm:$0xff] }
 0x1a6   : > { %4221 = vmatprep.mubr.msk.bf16.mxu1 %vm1112_vm1, %v1015_v49 }
 0x1a7   : > { %1402 = vmatmul.mubr.bf16.gmra.mrb[92].mxu1 %v1014_v48 }
 0x1a8   : > { %4715 = vmatprep.mubr.msk.bf16.mxu1 %vm5217_vm2, %v5216_v28 }
 0x1c2   : > { %v1219_v44 = vpop.f32.mrb[0].mxu1 }
 0x1c3   : > { %v1221_v45 = vpop.f32.mrb[1].mxu1 }
 0x1c4   : > { %v1222_v51 = vpop.f32.mrb[2].mxu1 }
 0x1c5   : > { %v1224_v52 = vpop.f32.mrb[3].mxu1 }
 0x1ca   : > { %v5586_v53 = vpop.f32.mrb[4].mxu1 }
 0x1cb   : > { %v1229_v54 = vpop.f32.mrb[5].mxu1 }
 0x1cc   : > { %v5588_v55 = vpop.f32.mrb[6].mxu1 }
 0x1cd   : > { %v1232_v56 = vpop.f32.mrb[7].mxu1 }
 0x1d2   : > { %v5590_v57 = vpop.f32.mrb[8].mxu1 }
 0x1d3   : > { %v1237_v58 = vpop.f32.mrb[9].mxu1 }
 0x1d4   : > { %v5592_v59 = vpop.f32.mrb[10].mxu1 }
 0x1d5   : > { %v1240_v60 = vpop.f32.mrb[11].mxu1 }
 0x1da   : > { %v5594_v61 = vpop.f32.mrb[12].mxu1 }
 0x1db   : > { %v1245_v62 = vpop.f32.mrb[13].mxu1 }
 0x1dc   : > { %v5596_v63 = vpop.f32.mrb[14].mxu1  ;;  %v5007_v62 = vld [vmem:[%s6403_s3 + $0xc8] ss:$12 sps:$4 sm:$0xff]  }
 0x1dd   : > { %v1248_v0 = vpop.f32.mrb[15].mxu1 }
 0x1e2   : > { %v5598_v1 = vpop.f32.mrb[16].mxu1 }
 0x1e3   : > { %v1253_v3 = vpop.f32.mrb[17].mxu1 }
 0x1e4   : > { %v5600_v4 = vpop.f32.mrb[18].mxu1 }
 0x1e5   : > { %v1256_v5 = vpop.f32.mrb[19].mxu1 }
 0x1ea   : > { %v5602_v6 = vpop.f32.mrb[20].mxu1 }
 0x1eb   : > { %v1261_v7 = vpop.f32.mrb[21].mxu1 }
 0x1ec   : > { %v5604_v8 = vpop.f32.mrb[22].mxu1 }
 0x1ed   : > { %v1264_v9 = vpop.f32.mrb[23].mxu1 }
 0x1f2   : > { %v5606_v10 = vpop.f32.mrb[24].mxu1 }
 0x1f3   : > { %v1269_v11 = vpop.f32.mrb[25].mxu1 }
 0x1f4   : > { %v5608_v12 = vpop.f32.mrb[26].mxu1 }
 0x1f5   : > { %v1272_v13 = vpop.f32.mrb[27].mxu1 }
 0x1fa   : > { %v5610_v14 = vpop.f32.mrb[28].mxu1 }
 0x1fb   : > { %v1277_v15 = vpop.f32.mrb[29].mxu1 }
 0x1fc   : > { %v5612_v16 = vpop.f32.mrb[30].mxu1 }
 0x1fd   : > { %v1280_v17 = vpop.f32.mrb[31].mxu1 }
 0x202   : > { %v5614_v18 = vpop.f32.mrb[32].mxu1 }
 0x203   : > { %v1285_v19 = vpop.f32.mrb[33].mxu1 }
 0x204   : > { %v5616_v20 = vpop.f32.mrb[34].mxu1 }
 0x205   : > { %v1288_v21 = vpop.f32.mrb[35].mxu1 }
 0x20a   : > { %v5618_v22 = vpop.f32.mrb[36].mxu1 }
 0x20b   : > { %v1293_v23 = vpop.f32.mrb[37].mxu1 }
 0x20c   : > { %v5620_v24 = vpop.f32.mrb[38].mxu1  ;;  %v5009_v23 = vld [vmem:[%s6403_s3 + $0x68] ss:$12 sps:$4 sm:$0xff]  }
 0x20d   : > { %v1296_v25 = vpop.f32.mrb[39].mxu1 }
 0x20e   : > { %v5010_v25 = vld [vmem:[%s6403_s3 + $0xf8] ss:$12 sps:$4 sm:$0xff]  }
 0x212   : > { %v5622_v26 = vpop.f32.mrb[40].mxu1 }
 0x213   : > { %v1301_v27 = vpop.f32.mrb[41].mxu1 }
 0x214   : > { %v5624_v29 = vpop.f32.mrb[42].mxu1 }
 0x215   : > { %v1304_v30 = vpop.f32.mrb[43].mxu1 }
 0x21a   : > { %v5626_v31 = vpop.f32.mrb[44].mxu1 }
 0x21b   : > { %v1309_v32 = vpop.f32.mrb[45].mxu1 }
 0x21c   : > { %v5628_v33 = vpop.f32.mrb[46].mxu1 }
 0x21d   : > { %v1312_v34 = vpop.f32.mrb[47].mxu1 }
 0x222   : > { %v1315_v36 = vpop.f32.mrb[48].mxu1 }
 0x223   : > { %v1410_v37 = vmax.f32 %v1219_v44, %v1315_v36  ;;  %v1317_v38 = vpop.f32.mrb[49].mxu1 }
 0x224   : > { %v1318_v42 = vpop.f32.mrb[50].mxu1 }
 0x225   : > { %v1434_v46 = vmul.f32 %v1410_v37, %v5633_v35  ;;  %v1411_v47 = vmax.f32 %v1222_v51, %v1318_v42  ;;  %v1320_v48 = vpop.f32.mrb[51].mxu1  ;;  %v5011_v37 = vld [vmem:[%s6403_s3 + $0x80] ss:$12 sps:$4 sm:$0xff]  }
 0x227   : > { %v1458_v49 = vadd.f32 %v1434_v46, %v5638_v39  ;;  %v1435_v50 = vmul.f32 %v1411_v47, %v5633_v35 }
 0x229   : > { %v1459_v45 = vadd.f32 %v1435_v50, %v5638_v39  ;;  %v1482_v54 = vmax.f32 %v1458_v49, 0.0 }
 0x22a   : > { %v1323_v52 = vpop.f32.mrb[52].mxu1 }
 0x22b   : > { %v1483_v44 = vmax.f32 %v1459_v45, 0.0  ;;  %v1412_v56 = vmax.f32 %v5586_v53, %v1323_v52  ;;  %v1325_v58 = vpop.f32.mrb[53].mxu1  ;;  %v5008_v53 = vld [vmem:[%s6403_s3 + $0xe0] ss:$12 sps:$4 sm:$0xff]   ;;  %v5013_v45 = vld [vmem:[%s6403_s3 + $0x98] ss:$12 sps:$4 sm:$0xff]  }
 0x22c   : > { %v1326_v60 = vpop.f32.mrb[54].mxu1  ;;  %v5014_v52 = vld [vmem:[%s6403_s3 + $0x128] ss:$12 sps:$4 sm:$0xff]  }
 0x22d   : > { %v5648_v0 = vpack.c.bf16 %v1483_v44, %v1482_v54  ;;  %v1436_v51 = vmul.f32 %v1412_v56, %v5633_v35  ;;  %v1413_v3 = vmax.f32 %v5588_v55, %v1326_v60  ;;  %v1328_v5 = vpop.f32.mrb[55].mxu1 }
 0x22f   : > { %v1460_v7 = vadd.f32 %v1436_v51, %v5638_v39  ;;  %v1437_v9 = vmul.f32 %v1413_v3, %v5633_v35  ;;  %4716 = vmatmul.mubr.msk.bf16.vlgmr.msra.gmra.mrb[96].mxu1 %vm1112_vm1, %v5648_v0  ;;  %v5019_v3 = vld [vmem:[%s6403_s3 + $0x4] ss:$12 sps:$4 sm:$0xff]  }
 0x230   : > { %4720 = vmatpush3.bf16.msra.mxu1 %v5007_v62  ;;  %4727 = vmatprep.mubr.msk.bf16.mxu1 %vm5217_vm2, %v5216_v28  ;;  %v5015_v62 = vld [vmem:[%s6403_s3 + $0xb0] ss:$12 sps:$4 sm:$0xff]  }
 0x231   : > { %v1461_v11 = vadd.f32 %v1437_v9, %v5638_v39  ;;  %4721 = vmatprep.subr.bf16.mxu1 %v5216_v28  ;;  %v1484_v13 = vmax.f32 %v1460_v7, 0.0 }
 0x232   : > { %v1331_v55 = vpop.f32.mrb[56].mxu1 }
 0x233   : > { %v1485_v15 = vmax.f32 %v1461_v11, 0.0  ;;  %v1414_v17 = vmax.f32 %v5590_v57, %v1331_v55  ;;  %v1333_v19 = vpop.f32.mrb[57].mxu1 }
 0x234   : > { %4722 = vmatpush3.bf16.msra.mxu1 %v5008_v53  ;;  %v1334_v21 = vpop.f32.mrb[58].mxu1 }
 0x235   : > { %v5670_v27 = vpack.c.bf16 %v1485_v15, %v1484_v13  ;;  %v1438_v30 = vmul.f32 %v1414_v17, %v5633_v35  ;;  %v1415_v32 = vmax.f32 %v5592_v59, %v1334_v21  ;;  %4723 = vmatprep.subr.bf16.mxu1 %v5216_v28  ;;  %v1336_v57 = vpop.f32.mrb[59].mxu1  ;;  %v5012_v59 = vld [vmem:[%s6403_s3 + $0x110] ss:$12 sps:$4 sm:$0xff]   ;;  %v5017_v13 = vld [vmem:[%s6403_s3] ss:$12 sps:$4 sm:$0xff]  }
 0x236   : > { %v5020_v15 = vld [vmem:[%s6403_s3 + $0x158] ss:$12 sps:$4 sm:$0xff]  }
 0x237   : > { %v1462_v34 = vadd.f32 %v1438_v30, %v5638_v39  ;;  %v1439_v36 = vmul.f32 %v1415_v32, %v5633_v35  ;;  %4250 = vmatmul.mubr.msk.bf16.vlgmr.msra.gmra.mrb[96].mxu0 %vm1112_vm1, %v5670_v27  ;;  %v5024_v32 = vld [vmem:[%s6403_s3 + $0x170] ss:$12 sps:$4 sm:$0xff]  }
 0x238   : > { %4696 = vmatpush3.bf16.msra.mxu0 %v5009_v23  ;;  %4724 = vmatpush3.bf16.msra.mxu1 %v5010_v25  ;;  %v5023_v23 = vld [vmem:[%s6403_s3 + $0x1c] ss:$12 sps:$4 sm:$0xff]  }
 0x239   : > { %v1463_v38 = vadd.f32 %v1439_v36, %v5638_v39  ;;  %4697 = vmatprep.subr.bf16.mxu0 %v5216_v28  ;;  %4725 = vmatprep.subr.bf16.mxu1 %v5216_v28  ;;  %v1486_v46 = vmax.f32 %v1462_v34, 0.0  ;;  %v5027_v34 = vld [vmem:[%s6403_s3 + $0x34] ss:$12 sps:$4 sm:$0xff]  }
 0x23a   : > { %v1339_v42 = vpop.f32.mrb[60].mxu1  ;;  %4703 = vmatprep.mubr.msk.bf16.mxu0 %vm5217_vm2, %v5216_v28 }
 0x23b   : > { %v1487_v47 = vmax.f32 %v1463_v38, 0.0  ;;  %v1416_v48 = vmax.f32 %v5594_v61, %v1339_v42  ;;  %v1341_v49 = vpop.f32.mrb[61].mxu1 }
 0x23c   : > { %4698 = vmatpush3.bf16.msra.mxu0 %v5011_v37  ;;  %4726 = vmatpush3.bf16.msra.mxu1 %v5012_v59  ;;  %v1342_v50 = vpop.f32.mrb[62].mxu1 }
 0x23d   : > { %v5697_v54 = vpack.c.bf16 %v1487_v47, %v1486_v46  ;;  %v1440_v44 = vmul.f32 %v1416_v48, %v5633_v35  ;;  %v1417_v56 = vmax.f32 %v5596_v63, %v1342_v50  ;;  %4699 = vmatprep.subr.bf16.mxu0 %v5216_v28  ;;  %4731 = vmatprep.subr.bf16.mxu1 %v5216_v28  ;;  %v1344_v61 = vpop.f32.mrb[63].mxu1  ;;  %v5016_v63 = vld [vmem:[%s6403_s3 + $0x140] ss:$12 sps:$4 sm:$0xff]   ;;  %v5025_v46 = vld [vmem:[%s6403_s3 + $0x30] ss:$12 sps:$4 sm:$0xff]  }
 0x23e   : > { %v5028_v47 = vld [vmem:[%s6403_s3 + $0x188] ss:$12 sps:$4 sm:$0xff]  }
 0x23f   : > { %v1464_v58 = vadd.f32 %v1440_v44, %v5638_v39  ;;  %v1441_v60 = vmul.f32 %v1417_v56, %v5633_v35  ;;  %4728 = vmatmul.mubr.msk.bf16.vlgmr.msra.gmra.mrb[100].mxu1 %vm1112_vm1, %v5697_v54  ;;  %v5032_v56 = vld [vmem:[%s6403_s3 + $0x1a0] ss:$12 sps:$4 sm:$0xff]  }
 0x240   : > { %4700 = vmatpush3.bf16.msra.mxu0 %v5013_v45  ;;  %4732 = vmatpush3.bf16.msra.mxu1 %v5014_v52  ;;  %v5031_v45 = vld [vmem:[%s6403_s3 + $0x4c] ss:$12 sps:$4 sm:$0xff]  }
 0x241   : > { %v1465_v51 = vadd.f32 %v1441_v60, %v5638_v39  ;;  %4701 = vmatprep.subr.bf16.mxu0 %v5216_v28  ;;  %4733 = vmatprep.subr.bf16.mxu1 %v5216_v28  ;;  %v1488_v7 = vmax.f32 %v1464_v58, 0.0  ;;  %v5035_v58 = vld [vmem:[%s6403_s3 + $0xc4] ss:$12 sps:$4 sm:$0xff]  }
 0x242   : > { %v1347_v5 = vpop.f32.mrb[64].mxu1  ;;  %4739 = vmatprep.mubr.msk.bf16.mxu1 %vm5217_vm2, %v5216_v28 }
 0x243   : > { %v1489_v9 = vmax.f32 %v1465_v51, 0.0  ;;  %v1418_v53 = vmax.f32 %v5598_v1, %v1347_v5  ;;  %v1349_v11 = vpop.f32.mrb[65].mxu1 }
 0x244   : > { %4702 = vmatpush3.bf16.msra.mxu0 %v5015_v62  ;;  %4734 = vmatpush3.bf16.msra.mxu1 %v5016_v63  ;;  %v1350_v55 = vpop.f32.mrb[66].mxu1 }
 0x245   : > { %v5728_v17 = vpack.c.bf16 %v1489_v9, %v1488_v7  ;;  %v1442_v19 = vmul.f32 %v1418_v53, %v5633_v35  ;;  %v1419_v21 = vmax.f32 %v5600_v4, %v1350_v55  ;;  %1769 = vmatprep.subr.bf16.mxu0 %v5019_v3  ;;  %4735 = vmatprep.subr.bf16.mxu1 %v5216_v28  ;;  %v1352_v1 = vpop.f32.mrb[67].mxu1  ;;  %v5021_v4 = vld [vmem:[%s6403_s3 + $0x18] ss:$12 sps:$4 sm:$0xff]   ;;  %v5033_v7 = vld [vmem:[%s6403_s3 + $0xc0] ss:$12 sps:$4 sm:$0xff]  }
 0x246   : > { %v5036_v9 = vld [vmem:[%s6403_s3 + $0x1b8] ss:$12 sps:$4 sm:$0xff]  }
 0x247   : > { %v1466_v25 = vadd.f32 %v1442_v19, %v5638_v39  ;;  %v1443_v30 = vmul.f32 %v1419_v21, %v5633_v35  ;;  %4704 = vmatmul.mubr.msk.bf16.vlgmr.msra.gmra.mrb[100].mxu0 %vm1112_vm1, %v5670_v27  ;;  %v5040_v21 = vld [vmem:[%s6403_s3 + $0x1d0] ss:$12 sps:$4 sm:$0xff]  }
 0x248   : > { %1770 = vmatpush1.bf16.msra.mxu0 %v5017_v13  ;;  %4736 = vmatpush3.bf16.msra.mxu1 %v5020_v15  ;;  %v5039_v13 = vld [vmem:[%s6403_s3 + $0xdc] ss:$12 sps:$4 sm:$0xff]  }
 0x249   : > { %v1467_v57 = vadd.f32 %v1443_v30, %v5638_v39  ;;  %1771 = vmatprep.subr.bf16.mxu0 %v5023_v23  ;;  %4737 = vmatprep.subr.bf16.mxu1 %v5216_v28  ;;  %v1490_v36 = vmax.f32 %v1466_v25, 0.0  ;;  %v5043_v23 = vld [vmem:[%s6403_s3 + $0xf4] ss:$12 sps:$4 sm:$0xff]  }
 0x24a   : > { %v1355_v27 = vpop.f32.mrb[68].mxu1  ;;  %1801 = vmatprep.mubr.bf16.mxu0 %v5215_v2 }
 0x24b   : > { %v1491_v37 = vmax.f32 %v1467_v57, 0.0  ;;  %v1420_v59 = vmax.f32 %v5602_v6, %v1355_v27  ;;  %v1357_v38 = vpop.f32.mrb[69].mxu1  ;;  %v5044_v27 = vld [vmem:[%s6403_s3 + $0x1e8] ss:$12 sps:$4 sm:$0xff]  }
 0x24c   : > { %1772 = vmatpush1.bf16.msra.mxu0 %v5021_v4  ;;  %4738 = vmatpush3.bf16.msra.mxu1 %v5024_v32  ;;  %v1358_v42 = vpop.f32.mrb[70].mxu1  ;;  %v5047_v38 = vld [vmem:[%s6403_s3 + $0x10c] ss:$12 sps:$4 sm:$0xff]  }
 0x24d   : > { %v5759_v48 = vpack.c.bf16 %v1491_v37, %v1490_v36  ;;  %v1444_v49 = vmul.f32 %v1420_v59, %v5633_v35  ;;  %v1421_v50 = vmax.f32 %v5604_v8, %v1358_v42  ;;  %1773 = vmatprep.subr.bf16.mxu0 %v5027_v34  ;;  %4743 = vmatprep.subr.bf16.mxu1 %v5216_v28  ;;  %v1360_v6 = vpop.f32.mrb[71].mxu1  ;;  %v5029_v8 = vld [vmem:[%s6403_s3 + $0x48] ss:$12 sps:$4 sm:$0xff]   ;;  %v5041_v34 = vld [vmem:[%s6403_s3 + $0xf0] ss:$12 sps:$4 sm:$0xff]  }
 0x24f   : > { %v1468_v52 = vadd.f32 %v1444_v49, %v5638_v39  ;;  %v1445_v44 = vmul.f32 %v1421_v50, %v5633_v35  ;;  %4740 = vmatmul.mubr.msk.bf16.vlgmr.msra.gmra.mrb[104].mxu1 %vm1112_vm1, %v5728_v17  ;;  %v5051_v50 = vld [vmem:[%s6403_s3 + $0x124] ss:$12 sps:$4 sm:$0xff]  }
 0x250   : > { %1774 = vmatpush1.bf16.msra.mxu0 %v5025_v46  ;;  %4744 = vmatpush3.bf16.msra.mxu1 %v5028_v47  ;;  %v5048_v47 = vld [vmem:[%s6403_s3 + $0x200] ss:$12 sps:$4 sm:$0xff]  }
 0x251   : > { %v1469_v61 = vadd.f32 %v1445_v44, %v5638_v39  ;;  %1775 = vmatprep.subr.bf16.mxu0 %v5031_v45  ;;  %4745 = vmatprep.subr.bf16.mxu1 %v5216_v28  ;;  %v1492_v62 = vmax.f32 %v1468_v52, 0.0 }
 0x252   : > { %v1363_v60 = vpop.f32.mrb[72].mxu1  ;;  %4751 = vmatprep.mubr.msk.bf16.mxu1 %vm5217_vm2, %v5216_v28 }
 0x253   : > { %v1493_v63 = vmax.f32 %v1469_v61, 0.0  ;;  %v1422_v51 = vmax.f32 %v5606_v10, %v1363_v60  ;;  %v1365_v3 = vpop.f32.mrb[73].mxu1  ;;  %v5049_v61 = vld [vmem:[%s6403_s3 + $0x120] ss:$12 sps:$4 sm:$0xff]  }
 0x254   : > { %1776 = vmatpush1.bf16.msra.mxu0 %v5029_v8  ;;  %4746 = vmatpush3.bf16.msra.mxu1 %v5032_v56  ;;  %v1366_v5 = vpop.f32.mrb[74].mxu1 }
 0x255   : > { %v5791_v53 = vpack.c.bf16 %v1493_v63, %v1492_v62  ;;  %v1446_v11 = vmul.f32 %v1422_v51, %v5633_v35  ;;  %v1423_v55 = vmax.f32 %v5608_v12, %v1366_v5  ;;  %1937 = vmatprep.subr.bf16.mxu0 %v5035_v58  ;;  %4747 = vmatprep.subr.bf16.mxu1 %v5216_v28  ;;  %v1368_v10 = vpop.f32.mrb[75].mxu1  ;;  %v5037_v12 = vld [vmem:[%s6403_s3 + $0xd8] ss:$12 sps:$4 sm:$0xff]   ;;  %v5055_v51 = vld [vmem:[%s6403_s3 + $0x13c] ss:$12 sps:$4 sm:$0xff]  }
 0x256   : > { %v5052_v58 = vld [vmem:[%s6403_s3 + $0x218] ss:$12 sps:$4 sm:$0xff]  }
 0x257   : > { %v1470_v15 = vadd.f32 %v1446_v11, %v5638_v39  ;;  %v1447_v19 = vmul.f32 %v1423_v55, %v5633_v35  ;;  %4264 = vmatmul.mubr.msk.bf16.vlgmr.msra.gmra.mrb[96].mxu0 %vm1112_vm1, %v5648_v0  ;;  %v5059_v11 = vld [vmem:[%s6403_s3 + $0x154] ss:$12 sps:$4 sm:$0xff]  }
 0x258   : > { %1938 = vmatpush1.bf16.msra.mxu0 %v5033_v7  ;;  %4748 = vmatpush3.bf16.msra.mxu1 %v5036_v9  ;;  %v5056_v7 = vld [vmem:[%s6403_s3 + $0x230] ss:$12 sps:$4 sm:$0xff]  }
 0x259   : > { %v1471_v1 = vadd.f32 %v1447_v19, %v5638_v39  ;;  %1939 = vmatprep.subr.bf16.mxu0 %v5039_v13  ;;  %4749 = vmatprep.subr.bf16.mxu1 %v5216_v28  ;;  %v1494_v25 = vmax.f32 %v1470_v15, 0.0 }
 0x25a   : > { %v1371_v0 = vpop.f32.mrb[76].mxu1  ;;  %1969 = vmatprep.mubr.bf16.mxu0 %v5215_v2 }
 0x25b   : > { %v1495_v30 = vmax.f32 %v1471_v1, 0.0  ;;  %v1424_v4 = vmax.f32 %v5610_v14, %v1371_v0  ;;  %v1373_v32 = vpop.f32.mrb[77].mxu1 }
 0x25c   : > { %1940 = vmatpush1.bf16.msra.mxu0 %v5037_v12  ;;  %4750 = vmatpush3.bf16.msra.mxu1 %v5040_v21  ;;  %v1374_v57 = vpop.f32.mrb[78].mxu1  ;;  %v5057_v12 = vld [vmem:[%s6403_s3 + $0x150] ss:$12 sps:$4 sm:$0xff]   ;;  %v5060_v21 = vld [vmem:[%s6403_s3 + $0x248] ss:$12 sps:$4 sm:$0xff]  }
 0x25d   : > { %v5822_v36 = vpack.c.bf16 %v1495_v30, %v1494_v25  ;;  %v1448_v37 = vmul.f32 %v1424_v4, %v5633_v35  ;;  %v1425_v59 = vmax.f32 %v5612_v16, %v1374_v57  ;;  %1941 = vmatprep.subr.bf16.mxu0 %v5043_v23  ;;  %4755 = vmatprep.subr.bf16.mxu1 %v5216_v28  ;;  %v1376_v14 = vpop.f32.mrb[79].mxu1  ;;  %v5045_v16 = vld [vmem:[%s6403_s3 + $0x108] ss:$12 sps:$4 sm:$0xff]   ;;  %v5063_v25 = vld [vmem:[%s6403_s3 + $0x16c] ss:$12 sps:$4 sm:$0xff]  }
 0x25e   : > { %v5064_v32 = vld [vmem:[%s6403_s3 + $0x260] ss:$12 sps:$4 sm:$0xff]  }
 0x25f   : > { %v1472_v42 = vadd.f32 %v1448_v37, %v5638_v39  ;;  %v1449_v46 = vmul.f32 %v1425_v59, %v5633_v35  ;;  %4752 = vmatmul.mubr.msk.bf16.vlgmr.msra.gmra.mrb[108].mxu1 %vm1112_vm1, %v5759_v48 }
 0x260   : > { %1942 = vmatpush1.bf16.msra.mxu0 %v5041_v34  ;;  %4756 = vmatpush3.bf16.msra.mxu1 %v5044_v27  ;;  %v5067_v34 = vld [vmem:[%s6403_s3 + $0x184] ss:$12 sps:$4 sm:$0xff]  }
 0x261   : > { %v1473_v49 = vadd.f32 %v1449_v46, %v5638_v39  ;;  %1943 = vmatprep.subr.bf16.mxu0 %v5047_v38  ;;  %4757 = vmatprep.subr.bf16.mxu1 %v5216_v28  ;;  %v1496_v45 = vmax.f32 %v1472_v42, 0.0  ;;  %v5065_v46 = vld [vmem:[%s6403_s3 + $0x180] ss:$12 sps:$4 sm:$0xff]  }
 0x262   : > { %v1379_v6 = vpop.f32.mrb[80].mxu1  ;;  %4763 = vmatprep.mubr.msk.bf16.mxu1 %vm5217_vm2, %v5216_v28 }
 0x263   : > { %v1497_v52 = vmax.f32 %v1473_v49, 0.0  ;;  %v1426_v44 = vmax.f32 %v5614_v18, %v1379_v6  ;;  %v1381_v8 = vpop.f32.mrb[81].mxu1  ;;  %v5071_v6 = vld [vmem:[%s6403_s3 + $0x19c] ss:$12 sps:$4 sm:$0xff]  }
 0x264   : > { %1944 = vmatpush1.bf16.msra.mxu0 %v5045_v16  ;;  %4758 = vmatpush3.bf16.msra.mxu1 %v5048_v47  ;;  %v1382_v56 = vpop.f32.mrb[82].mxu1  ;;  %v5068_v16 = vld [vmem:[%s6403_s3 + $0x278] ss:$12 sps:$4 sm:$0xff]  }
 0x265   : > { %v5854_v60 = vpack.c.bf16 %v1497_v52, %v1496_v45  ;;  %v1450_v62 = vmul.f32 %v1426_v44, %v5633_v35  ;;  %v1427_v63 = vmax.f32 %v5616_v20, %v1382_v56  ;;  %2111 = vmatprep.subr.bf16.mxu0 %v5051_v50  ;;  %4759 = vmatprep.subr.bf16.mxu1 %v5216_v28  ;;  %v1384_v18 = vpop.f32.mrb[83].mxu1  ;;  %v5053_v20 = vld [vmem:[%s6403_s3 + $0x138] ss:$12 sps:$4 sm:$0xff]   ;;  %v5072_v44 = vld [vmem:[%s6403_s3 + $0x290] ss:$12 sps:$4 sm:$0xff]  }
 0x266   : > { %v5075_v56 = vld [vmem:[%s6403_s3 + $0x1b4] ss:$12 sps:$4 sm:$0xff]  }
 0x267   : > { %v1474_v3 = vadd.f32 %v1450_v62, %v5638_v39  ;;  %v1451_v5 = vmul.f32 %v1427_v63, %v5633_v35  ;;  %4294 = vmatmul.mubr.msk.bf16.vlgmr.msra.gmra.mrb[96].mxu0 %vm1112_vm1, %v5697_v54 }
 0x268   : > { %2112 = vmatpush1.bf16.msra.mxu0 %v5049_v61  ;;  %4760 = vmatpush3.bf16.msra.mxu1 %v5052_v58 }
 0x269   : > { %v1475_v9 = vadd.f32 %v1451_v5, %v5638_v39  ;;  %2113 = vmatprep.subr.bf16.mxu0 %v5055_v51  ;;  %4761 = vmatprep.subr.bf16.mxu1 %v5216_v28  ;;  %v1498_v55 = vmax.f32 %v1474_v3, 0.0  ;;  %v5073_v51 = vld [vmem:[%s6403_s3 + $0x1b0] ss:$12 sps:$4 sm:$0xff]   ;;  %v5076_v3 = vld [vmem:[%s6403_s3 + $0x2a8] ss:$12 sps:$4 sm:$0xff]  }
 0x26a   : > { %v1387_v54 = vpop.f32.mrb[84].mxu1  ;;  %2143 = vmatprep.mubr.bf16.mxu0 %v5215_v2 }
 0x26b   : > { %v1499_v10 = vmax.f32 %v1475_v9, 0.0  ;;  %v1428_v13 = vmax.f32 %v5618_v22, %v1387_v54  ;;  %v1389_v15 = vpop.f32.mrb[85].mxu1 }
 0x26c   : > { %2114 = vmatpush1.bf16.msra.mxu0 %v5053_v20  ;;  %4762 = vmatpush3.bf16.msra.mxu1 %v5056_v7  ;;  %v1390_v19 = vpop.f32.mrb[86].mxu1 }
 0x26d   : > { %v5885_v1 = vpack.c.bf16 %v1499_v10, %v1498_v55  ;;  %v1452_v23 = vmul.f32 %v1428_v13, %v5633_v35  ;;  %v1429_v0 = vmax.f32 %v5620_v24, %v1390_v19  ;;  %2115 = vmatprep.subr.bf16.mxu0 %v5059_v11  ;;  %4767 = vmatprep.subr.bf16.mxu1 %v5216_v28  ;;  %v1392_v22 = vpop.f32.mrb[87].mxu1  ;;  %v5061_v24 = vld [vmem:[%s6403_s3 + $0x168] ss:$12 sps:$4 sm:$0xff]   ;;  %v5080_v55 = vld [vmem:[%s6403_s3 + $0x2c0] ss:$12 sps:$4 sm:$0xff]  }
 0x26e   : > { %v5081_v19 = vld [vmem:[%s6403_s3 + $0x1e0] ss:$12 sps:$4 sm:$0xff]  }
 0x26f   : > { %v1476_v30 = vadd.f32 %v1452_v23, %v5638_v39  ;;  %v1453_v4 = vmul.f32 %v1429_v0, %v5633_v35  ;;  %4764 = vmatmul.mubr.msk.bf16.vlgmr.msra.gmra.mrb[112].mxu1 %vm1112_vm1, %v5791_v53  ;;  %v5085_v23 = vld [vmem:[%s6403_s3 + $0x1f8] ss:$12 sps:$4 sm:$0xff]   ;;  %v5088_v0 = vld [vmem:[%s6403_s3 + $0x2f0] ss:$12 sps:$4 sm:$0xff]   ;;  %v5091_v22 = vld [vmem:[%s6403_s3 + $0x214] ss:$12 sps:$4 sm:$0xff]  }
 0x270   : > { %2116 = vmatpush1.bf16.msra.mxu0 %v5057_v12  ;;  %4768 = vmatpush3.bf16.msra.mxu1 %v5060_v21  ;;  %v5087_v21 = vld [vmem:[%s6403_s3 + $0x1fc] ss:$12 sps:$4 sm:$0xff]  }
 0x271   : > { %v1477_v57 = vadd.f32 %v1453_v4, %v5638_v39  ;;  %2117 = vmatprep.subr.bf16.mxu0 %v5063_v25  ;;  %4769 = vmatprep.subr.bf16.mxu1 %v5216_v28  ;;  %v1500_v37 = vmax.f32 %v1476_v30, 0.0  ;;  %v5092_v25 = vld [vmem:[%s6403_s3 + $0x308] ss:$12 sps:$4 sm:$0xff]   ;;  %v5095_v30 = vld [vmem:[%s6403_s3 + $0x22c] ss:$12 sps:$4 sm:$0xff]  }
 0x272   : > { %v1395_v27 = vpop.f32.mrb[88].mxu1  ;;  %4775 = vmatprep.mubr.msk.bf16.mxu1 %vm5217_vm2, %v5216_v28  ;;  %v5093_v4 = vld [vmem:[%s6403_s3 + $0x228] ss:$12 sps:$4 sm:$0xff]  }
 0x273   : > { %v1501_v59 = vmax.f32 %v1477_v57, 0.0  ;;  %v1430_v14 = vmax.f32 %v5622_v26, %v1395_v27  ;;  %v1397_v38 = vpop.f32.mrb[89].mxu1  ;;  %v5097_v57 = vld [vmem:[%s6403_s3 + $0x240] ss:$12 sps:$4 sm:$0xff]   ;;  %v5103_v27 = vld [vmem:[%s6403_s3 + $0x25c] ss:$12 sps:$4 sm:$0xff]  }
 0x274   : > { %2118 = vmatpush1.bf16.msra.mxu0 %v5061_v24  ;;  %4770 = vmatpush3.bf16.msra.mxu1 %v5064_v32  ;;  %v1398_v42 = vpop.f32.mrb[90].mxu1  ;;  %v5096_v24 = vld [vmem:[%s6403_s3 + $0x320] ss:$12 sps:$4 sm:$0xff]   ;;  %v5099_v32 = vld [vmem:[%s6403_s3 + $0x244] ss:$12 sps:$4 sm:$0xff]  }
 0x275   : > { %v5917_v47 = vpack.c.bf16 %v1501_v59, %v1500_v37  ;;  %v1454_v49 = vmul.f32 %v1430_v14, %v5633_v35  ;;  %v1431_v50 = vmax.f32 %v5624_v29, %v1398_v42  ;;  %2285 = vmatprep.subr.bf16.mxu0 %v5067_v34  ;;  %4771 = vmatprep.subr.bf16.mxu1 %v5216_v28  ;;  %v1400_v26 = vpop.f32.mrb[91].mxu1  ;;  %v5069_v29 = vld [vmem:[%s6403_s3 + $0x198] ss:$12 sps:$4 sm:$0xff]   ;;  %v5104_v59 = vld [vmem:[%s6403_s3 + $0x350] ss:$12 sps:$4 sm:$0xff]  }
 0x276   : > { %v5100_v34 = vld [vmem:[%s6403_s3 + $0x338] ss:$12 sps:$4 sm:$0xff]   ;;  %v5107_v14 = vld [vmem:[%s6403_s3 + $0x274] ss:$12 sps:$4 sm:$0xff]  }
 0x277   : > { %v1478_v45 = vadd.f32 %v1454_v49, %v5638_v39  ;;  %v1455_v52 = vmul.f32 %v1431_v50, %v5633_v35  ;;  %4324 = vmatmul.mubr.msk.bf16.vlgmr.msra.gmra.mrb[96].mxu0 %vm1112_vm1, %v5728_v17  ;;  %v5101_v37 = vld [vmem:[%s6403_s3 + $0x258] ss:$12 sps:$4 sm:$0xff]   ;;  %v5108_v38 = vld [vmem:[%s6403_s3 + $0x368] ss:$12 sps:$4 sm:$0xff]   ;;  %v5113_v50 = vld [vmem:[%s6403_s3 + $0x2a0] ss:$12 sps:$4 sm:$0xff]  }
 0x278   : > { %2286 = vmatpush1.bf16.msra.mxu0 %v5065_v46  ;;  %4772 = vmatpush3.bf16.msra.mxu1 %v5068_v16  ;;  %v5111_v42 = vld [vmem:[%s6403_s3 + $0x28c] ss:$12 sps:$4 sm:$0xff]   ;;  %v5109_v46 = vld [vmem:[%s6403_s3 + $0x288] ss:$12 sps:$4 sm:$0xff]   ;;  %v5115_v49 = vld [vmem:[%s6403_s3 + $0x2a4] ss:$12 sps:$4 sm:$0xff]  }
 0x279   : > { %v1479_v8 = vadd.f32 %v1455_v52, %v5638_v39  ;;  %2287 = vmatprep.subr.bf16.mxu0 %v5071_v6  ;;  %4773 = vmatprep.subr.bf16.mxu1 %v5216_v28  ;;  %v1502_v61 = vmax.f32 %v1478_v45, 0.0  ;;  %v5112_v16 = vld [vmem:[%s6403_s3 + $0x380] ss:$12 sps:$4 sm:$0xff]   ;;  %v5116_v26 = vld [vmem:[%s6403_s3 + $0x398] ss:$12 sps:$4 sm:$0xff]  }
 0x27a   : > { %v1403_v17 = vpop.f32.mrb[92].mxu1  ;;  %2317 = vmatprep.mubr.bf16.mxu0 %v5215_v2  ;;  %v5119_v6 = vld [vmem:[%s6403_s3 + $0x2bc] ss:$12 sps:$4 sm:$0xff]   ;;  %v5117_v45 = vld [vmem:[%s6403_s3 + $0x2b8] ss:$12 sps:$4 sm:$0xff]  }
 0x27b   : > { %v1503_v58 = vmax.f32 %v1479_v8, 0.0  ;;  %v1432_v62 = vmax.f32 %v5626_v31, %v1403_v17  ;;  %v1405_v63 = vpop.f32.mrb[93].mxu1  ;;  %v5079_v31 = vld [vmem:[%s6403_s3 + $0x1cc] ss:$12 sps:$4 sm:$0xff]   ;;  %v5120_v52 = vld [vmem:[%s6403_s3 + $0x3b0] ss:$12 sps:$4 sm:$0xff]  }
 0x27c   : > { %2288 = vmatpush1.bf16.msra.mxu0 %v5069_v29  ;;  %4774 = vmatpush3.bf16.msra.mxu1 %v5072_v44  ;;  %v1406_v18 = vpop.f32.mrb[94].mxu1  ;;  %v5123_v29 = vld [vmem:[%s6403_s3 + $0x2d4] ss:$12 sps:$4 sm:$0xff]   ;;  %v5127_v8 = vld [vmem:[%s6403_s3 + $0x2ec] ss:$12 sps:$4 sm:$0xff]  }
 0x27d   : > { %v5948_v5 = vpack.c.bf16 %v1503_v58, %v1502_v61  ;;  %v1456_v20 = vmul.f32 %v1432_v62, %v5633_v35  ;;  %v1433_v7 = vmax.f32 %v5628_v33, %v1406_v18  ;;  %2289 = vmatprep.subr.bf16.mxu0 %v5075_v56  ;;  %4779 = vmatprep.subr.bf16.mxu1 %v5216_v28  ;;  %v1408_v9 = vpop.f32.mrb[95].mxu1  ;;  %v5077_v33 = vld [vmem:[%s6403_s3 + $0x1c8] ss:$12 sps:$4 sm:$0xff]   ;;  %v5128_v17 = vld [vmem:[%s6403_s3 + $0x3e0] ss:$12 sps:$4 sm:$0xff]  }
 0x27e   : > { %v5124_v44 = vld [vmem:[%s6403_s3 + $0x3c8] ss:$12 sps:$4 sm:$0xff]   ;;  %v5131_v61 = vld [vmem:[%s6403_s3 + $0x304] ss:$12 sps:$4 sm:$0xff]   ;;  %v5129_v58 = vld [vmem:[%s6403_s3 + $0x300] ss:$12 sps:$4 sm:$0xff]  }
 0x27f   : > { %v1480_v11 = vadd.f32 %v1456_v20, %v5638_v39  ;;  %v1457_v54 = vmul.f32 %v1433_v7, %v5633_v35  ;;  %4776 = vmatmul.mubr.msk.bf16.vlgmr.msra.gmra.mrb[116].mxu1 %vm1112_vm1, %v5822_v36  ;;  %v5083_v35 = vld [vmem:[%s6403_s3 + $0x1e4] ss:$12 sps:$4 sm:$0xff]   ;;  %v5125_v56 = vld [vmem:[%s6403_s3 + $0x2e8] ss:$12 sps:$4 sm:$0xff]   ;;  %v5143_v7 = vld [vmem:[%s6403_s3 + $0x34c] ss:$12 sps:$4 sm:$0xff]  }
 0x280   : > { %2290 = vmatpush1.bf16.msra.mxu0 %v5073_v51  ;;  %4780 = vmatpush3.bf16.msra.mxu1 %v5076_v3  ;;  %v5132_v62 = vld [vmem:[%s6403_s3 + $0x3f8] ss:$12 sps:$4 sm:$0xff]   ;;  %v5135_v63 = vld [vmem:[%s6403_s3 + $0x31c] ss:$12 sps:$4 sm:$0xff]   ;;  %v5139_v3 = vld [vmem:[%s6403_s3 + $0x334] ss:$12 sps:$4 sm:$0xff]  }
 0x281   : > { %v1481_v10 = vadd.f32 %v1457_v54, %v5638_v39  ;;  %2291 = vmatprep.subr.bf16.mxu0 %v5079_v31  ;;  %4781 = vmatprep.subr.bf16.mxu1 %v5216_v28  ;;  %v1504_v13 = vmax.f32 %v1480_v11, 0.0  ;;  %v5084_v39 = vld [vmem:[%s6403_s3 + $0x2d8] ss:$12 sps:$4 sm:$0xff]   ;;  %v5136_v51 = vld [vmem:[%s6403_s3 + $0x410] ss:$12 sps:$4 sm:$0xff]  }
 0x282   : > { %4787 = vmatprep.mubr.msk.bf16.mxu1 %vm5217_vm2, %v5216_v28  ;;  %v5133_v18 = vld [vmem:[%s6403_s3 + $0x318] ss:$12 sps:$4 sm:$0xff]   ;;  %v5140_v20 = vld [vmem:[%s6403_s3 + $0x428] ss:$12 sps:$4 sm:$0xff]   ;;  %v5144_v9 = vld [vmem:[%s6403_s3 + $0x440] ss:$12 sps:$4 sm:$0xff]  }
 0x283   : > { %v1505_v15 = vmax.f32 %v1481_v10, 0.0  ;;  %v5141_v31 = vld [vmem:[%s6403_s3 + $0x348] ss:$12 sps:$4 sm:$0xff]   ;;  %v5147_v11 = vld [vmem:[%s6403_s3 + $0x364] ss:$12 sps:$4 sm:$0xff]  }
 0x284   : > { %2292 = vmatpush1.bf16.msra.mxu0 %v5077_v33  ;;  %4782 = vmatpush3.bf16.msra.mxu1 %v5080_v55  ;;  %v5145_v54 = vld [vmem:[%s6403_s3 + $0x360] ss:$12 sps:$4 sm:$0xff]   ;;  %v5148_v33 = vld [vmem:[%s6403_s3 + $0x458] ss:$12 sps:$4 sm:$0xff]   ;;  %v5151_v55 = vld [vmem:[%s6403_s3 + $0x37c] ss:$12 sps:$4 sm:$0xff]  }
 0x285   : > { %v5979_v12 = vpack.c.bf16 %v1505_v15, %v1504_v13  ;;  %2459 = vmatprep.subr.bf16.mxu0 %v5083_v35  ;;  %4783 = vmatprep.subr.bf16.mxu1 %v5216_v28  ;;  %v5149_v10 = vld [vmem:[%s6403_s3 + $0x378] ss:$12 sps:$4 sm:$0xff]   ;;  %v5152_v35 = vld [vmem:[%s6403_s3 + $0x470] ss:$12 sps:$4 sm:$0xff]   ;;  %v5155_v13 = vld [vmem:[%s6403_s3 + $0x394] ss:$12 sps:$4 sm:$0xff]  }
 0x286   : > { %v5158_v15 = vld [vmem:[%s6403_s3 + $0x3ac] ss:$12 sps:$4 sm:$0xff]  }
 0x287   : > { %4354 = vmatmul.mubr.msk.bf16.vlgmr.msra.gmra.mrb[96].mxu0 %vm1112_vm1, %v5759_v48  ;;  %v5089_v48 = vld [vmem:[%s6403_s3 + $0x210] ss:$12 sps:$4 sm:$0xff]  }
 0x288   : > { %2460 = vmatpush1.bf16.msra.mxu0 %v5081_v19  ;;  %4784 = vmatpush3.bf16.msra.mxu1 %v5084_v39  ;;  %v5156_v19 = vld [vmem:[%s6403_s3 + $0x3a8] ss:$12 sps:$4 sm:$0xff]   ;;  %v5161_v39 = vld [vmem:[%s6403_s3 + $0x3c4] ss:$12 sps:$4 sm:$0xff]  }
 0x289   : > { %2461 = vmatprep.subr.bf16.mxu0 %v5087_v21  ;;  %4785 = vmatprep.subr.bf16.mxu1 %v5216_v28  ;;  %v5159_v21 = vld [vmem:[%s6403_s3 + $0x3c0] ss:$12 sps:$4 sm:$0xff]  }
 0x28a   : > { %2491 = vmatprep.mubr.bf16.mxu0 %v5215_v2 }
 0x28c   : > { %2462 = vmatpush1.bf16.msra.mxu0 %v5085_v23  ;;  %4786 = vmatpush3.bf16.msra.mxu1 %v5088_v0  ;;  %v5164_v23 = vld [vmem:[%s6403_s3 + $0x3dc] ss:$12 sps:$4 sm:$0xff]   ;;  %v5162_v0 = vld [vmem:[%s6403_s3 + $0x3d8] ss:$12 sps:$4 sm:$0xff]  }
 0x28d   : > { %2463 = vmatprep.subr.bf16.mxu0 %v5091_v22  ;;  %4791 = vmatprep.subr.bf16.mxu1 %v5216_v28  ;;  %v5167_v22 = vld [vmem:[%s6403_s3 + $0x3f4] ss:$12 sps:$4 sm:$0xff]  }
 0x28f   : > { %4788 = vmatmul.mubr.msk.bf16.vlgmr.msra.gmra.mrb[120].mxu1 %vm1112_vm1, %v5854_v60 }
 0x290   : > { %2464 = vmatpush1.bf16.msra.mxu0 %v5089_v48  ;;  %4792 = vmatpush3.bf16.msra.mxu1 %v5092_v25  ;;  %v5165_v48 = vld [vmem:[%s6403_s3 + $0x3f0] ss:$12 sps:$4 sm:$0xff]   ;;  %v5168_v25 = vld [vmem:[%s6403_s3 + $0x408] ss:$12 sps:$4 sm:$0xff]  }
 0x291   : > { %2465 = vmatprep.subr.bf16.mxu0 %v5095_v30  ;;  %4793 = vmatprep.subr.bf16.mxu1 %v5216_v28  ;;  %v5173_v30 = vld [vmem:[%s6403_s3 + $0x424] ss:$12 sps:$4 sm:$0xff]  }
 0x292   : > { %4799 = vmatprep.mubr.msk.bf16.mxu1 %vm5217_vm2, %v5216_v28 }
 0x294   : > { %2466 = vmatpush1.bf16.msra.mxu0 %v5093_v4  ;;  %4794 = vmatpush3.bf16.msra.mxu1 %v5096_v24  ;;  %v5171_v4 = vld [vmem:[%s6403_s3 + $0x420] ss:$12 sps:$4 sm:$0xff]   ;;  %v5176_v24 = vld [vmem:[%s6403_s3 + $0x43c] ss:$12 sps:$4 sm:$0xff]  }
 0x295   : > { %2633 = vmatprep.subr.bf16.mxu0 %v5099_v32  ;;  %4795 = vmatprep.subr.bf16.mxu1 %v5216_v28  ;;  %v5174_v32 = vld [vmem:[%s6403_s3 + $0x438] ss:$12 sps:$4 sm:$0xff]  }
 0x297   : > { %4384 = vmatmul.mubr.msk.bf16.vlgmr.msra.gmra.mrb[96].mxu0 %vm1112_vm1, %v5791_v53  ;;  %v5105_v53 = vld [vmem:[%s6403_s3 + $0x270] ss:$12 sps:$4 sm:$0xff]  }
 0x298   : > { %2634 = vmatpush1.bf16.msra.mxu0 %v5097_v57  ;;  %4796 = vmatpush3.bf16.msra.mxu1 %v5100_v34  ;;  %v5179_v57 = vld [vmem:[%s6403_s3 + $0x454] ss:$12 sps:$4 sm:$0xff]   ;;  %v5177_v34 = vld [vmem:[%s6403_s3 + $0x450] ss:$12 sps:$4 sm:$0xff]  }
 0x299   : > { %2635 = vmatprep.subr.bf16.mxu0 %v5103_v27  ;;  %4797 = vmatprep.subr.bf16.mxu1 %v5216_v28 }
 0x29a   : > { %2665 = vmatprep.mubr.bf16.mxu0 %v5215_v2 }
 0x29c   : > { %2636 = vmatpush1.bf16.msra.mxu0 %v5101_v37  ;;  %4798 = vmatpush3.bf16.msra.mxu1 %v5104_v59 }
 0x29d   : > { %2637 = vmatprep.subr.bf16.mxu0 %v5107_v14  ;;  %4803 = vmatprep.subr.bf16.mxu1 %v5216_v28 }
 0x29f   : > { %4800 = vmatmul.mubr.msk.bf16.vlgmr.msra.gmra.mrb[124].mxu1 %vm1112_vm1, %v5885_v1 }
 0x2a0   : > { %2638 = vmatpush1.bf16.msra.mxu0 %v5105_v53  ;;  %4804 = vmatpush3.bf16.msra.mxu1 %v5108_v38  ;;  %v5183_v53 = vld [vmem:[%s6404_s4 + $0x80] sm:$0xff]   ;;  %v5184_v38 = vld [vmem:[%s6404_s4 + $0x88] sm:$0xff]  }
 0x2a1   : > { %2639 = vmatprep.subr.bf16.mxu0 %v5111_v42  ;;  %4805 = vmatprep.subr.bf16.mxu1 %v5216_v28 }
 0x2a2   : > { %4811 = vmatprep.mubr.msk.bf16.mxu1 %vm5217_vm2, %v5216_v28 }
 0x2a4   : > { %2640 = vmatpush1.bf16.msra.mxu0 %v5109_v46  ;;  %4806 = vmatpush3.bf16.msra.mxu1 %v5112_v16  ;;  %v5185_v16 = vld [vmem:[%s6404_s4 + $0x90] sm:$0xff]  }
 0x2a5   : > { %2807 = vmatprep.subr.bf16.mxu0 %v5115_v49  ;;  %4807 = vmatprep.subr.bf16.mxu1 %v5216_v28 }
 0x2a7   : > { %4414 = vmatmul.mubr.msk.bf16.vlgmr.msra.gmra.mrb[96].mxu0 %vm1112_vm1, %v5822_v36  ;;  %v5121_v36 = vld [vmem:[%s6403_s3 + $0x2d0] ss:$12 sps:$4 sm:$0xff]  }
 0x2a8   : > { %2808 = vmatpush1.bf16.msra.mxu0 %v5113_v50  ;;  %4808 = vmatpush3.bf16.msra.mxu1 %v5116_v26  ;;  %v5186_v50 = vld [vmem:[%s6404_s4 + $0x98] sm:$0xff]  }
 0x2a9   : > { %2809 = vmatprep.subr.bf16.mxu0 %v5119_v6  ;;  %4809 = vmatprep.subr.bf16.mxu1 %v5216_v28  ;;  %v5187_v6 = vld [vmem:[%s6404_s4 + $0xa0] sm:$0xff]  }
 0x2aa   : > { %2839 = vmatprep.mubr.bf16.mxu0 %v5215_v2 }
 0x2ac   : > { %2810 = vmatpush1.bf16.msra.mxu0 %v5117_v45  ;;  %4810 = vmatpush3.bf16.msra.mxu1 %v5120_v52 }
 0x2ad   : > { %2811 = vmatprep.subr.bf16.mxu0 %v5123_v29  ;;  %4815 = vmatprep.subr.bf16.mxu1 %v5216_v28 }
 0x2af   : > { %4812 = vmatmul.mubr.msk.bf16.vlgmr.msra.gmra.mrb[128].mxu1 %vm1112_vm1, %v5917_v47 }
 0x2b0   : > { %2812 = vmatpush1.bf16.msra.mxu0 %v5121_v36  ;;  %4816 = vmatpush3.bf16.msra.mxu1 %v5124_v44 }
 0x2b1   : > { %2813 = vmatprep.subr.bf16.mxu0 %v5127_v8  ;;  %4817 = vmatprep.subr.bf16.mxu1 %v5216_v28 }
 0x2b2   : > { %4823 = vmatprep.mubr.msk.bf16.mxu1 %vm5217_vm2, %v5216_v28 }
 0x2b4   : > { %2814 = vmatpush1.bf16.msra.mxu0 %v5125_v56  ;;  %4818 = vmatpush3.bf16.msra.mxu1 %v5128_v17  ;;  %v5188_v17 = vld [vmem:[%s6404_s4 + $0xa8] sm:$0xff]  }
 0x2b5   : > { %2981 = vmatprep.subr.bf16.mxu0 %v5131_v61  ;;  %4819 = vmatprep.subr.bf16.mxu1 %v5216_v28 }
 0x2b7   : > { %4444 = vmatmul.mubr.msk.bf16.vlgmr.msra.gmra.mrb[96].mxu0 %vm1112_vm1, %v5854_v60  ;;  %v5137_v60 = vld [vmem:[%s6403_s3 + $0x330] ss:$12 sps:$4 sm:$0xff]  }
 0x2b8   : > { %2982 = vmatpush1.bf16.msra.mxu0 %v5129_v58  ;;  %4820 = vmatpush3.bf16.msra.mxu1 %v5132_v62 }
 0x2b9   : > { %2983 = vmatprep.subr.bf16.mxu0 %v5135_v63  ;;  %4821 = vmatprep.subr.bf16.mxu1 %v5216_v28 }
 0x2ba   : > { %3013 = vmatprep.mubr.bf16.mxu0 %v5215_v2 }
 0x2bc   : > { %2984 = vmatpush1.bf16.msra.mxu0 %v5133_v18  ;;  %4822 = vmatpush3.bf16.msra.mxu1 %v5136_v51  ;;  %v5189_v18 = vld [vmem:[%s6404_s4 + $0xb0] sm:$0xff]  }
 0x2bd   : > { %2985 = vmatprep.subr.bf16.mxu0 %v5139_v3  ;;  %4827 = vmatprep.subr.bf16.mxu1 %v5216_v28 }
 0x2bf   : > { %4824 = vmatmul.mubr.msk.bf16.vlgmr.msra.gmra.mrb[132].mxu1 %vm1112_vm1, %v5948_v5 }
 0x2c0   : > { %2986 = vmatpush1.bf16.msra.mxu0 %v5137_v60  ;;  %4828 = vmatpush3.bf16.msra.mxu1 %v5140_v20  ;;  %v5190_v60 = vld [vmem:[%s6404_s4 + $0xb8] sm:$0xff]   ;;  %v5191_v20 = vld [vmem:[%s6404_s4 + $0x40] sm:$0xff]  }
 0x2c1   : > { %2987 = vmatprep.subr.bf16.mxu0 %v5143_v7  ;;  %4829 = vmatprep.subr.bf16.mxu1 %v5216_v28  ;;  %v5192_v7 = vld [vmem:[%s6404_s4] sm:$0xff]  }
 0x2c2   : > { %4835 = vmatprep.mubr.msk.bf16.mxu1 %vm5217_vm2, %v5216_v28 }
 0x2c4   : > { %2988 = vmatpush1.bf16.msra.mxu0 %v5141_v31  ;;  %4830 = vmatpush3.bf16.msra.mxu1 %v5144_v9  ;;  %v5193_v31 = vld [vmem:[%s6404_s4 + $0x48] sm:$0xff]   ;;  %v5195_v9 = vld [vmem:[%s6404_s4 + $0x50] sm:$0xff]  }
 0x2c5   : > { %3155 = vmatprep.subr.bf16.mxu0 %v5147_v11  ;;  %4831 = vmatprep.subr.bf16.mxu1 %v5216_v28 }
 0x2c7   : > { %4474 = vmatmul.mubr.msk.bf16.vlgmr.msra.gmra.mrb[96].mxu0 %vm1112_vm1, %v5885_v1  ;;  %v5153_v1 = vld [vmem:[%s6403_s3 + $0x390] ss:$12 sps:$4 sm:$0xff]  }
 0x2c8   : > { %3156 = vmatpush1.bf16.msra.mxu0 %v5145_v54  ;;  %4832 = vmatpush3.bf16.msra.mxu1 %v5148_v33 }
 0x2c9   : > { %3157 = vmatprep.subr.bf16.mxu0 %v5151_v55  ;;  %4833 = vmatprep.subr.bf16.mxu1 %v5216_v28 }
 0x2ca   : > { %3187 = vmatprep.mubr.bf16.mxu0 %v5215_v2 }
 0x2cc   : > { %3158 = vmatpush1.bf16.msra.mxu0 %v5149_v10  ;;  %4834 = vmatpush3.bf16.msra.mxu1 %v5152_v35  ;;  %v5196_v10 = vld [vmem:[%s6404_s4 + $0x10] sm:$0xff]  }
 0x2cd   : > { %3159 = vmatprep.subr.bf16.mxu0 %v5155_v13  ;;  %4839 = vmatprep.subr.bf16.mxu1 %v5216_v28 }
 0x2cf   : > { %4836 = vmatmul.mubr.msk.bf16.vlgmr.msra.gmra.mrb[136].mxu1 %vm1112_vm1, %v5979_v12 }
 0x2d0   : > { %3160 = vmatpush1.bf16.msra.mxu0 %v5153_v1  ;;  %4855 = vmatprep.mubr.msk.bf16.mxu1 %vm5217_vm2, %v5216_v28  ;;  %v5197_v1 = vld [vmem:[%s6404_s4 + $0x58] sm:$0xff]  }
 0x2d1   : > { %3161 = vmatprep.subr.bf16.mxu0 %v5158_v15  ;;  %4840 = vmatpush3.bf16.msra.mxu1 %v5183_v53  ;;  %v5198_v15 = vld [vmem:[%s6404_s4 + $0x18] sm:$0xff]  }
 0x2d2   : > { %4841 = vmatprep.subr.bf16.mxu1 %v5216_v28 }
 0x2d4   : > { %3162 = vmatpush1.bf16.msra.mxu0 %v5156_v19  ;;  %v5199_v19 = vld [vmem:[%s6404_s4 + $0x60] sm:$0xff]  }
 0x2d5   : > { %3329 = vmatprep.subr.bf16.mxu0 %v5161_v39  ;;  %4842 = vmatpush3.bf16.msra.mxu1 %v5184_v38  ;;  %v5200_v39 = vld [vmem:[%s6404_s4 + $0x20] sm:$0xff]  }
 0x2d6   : > { %4843 = vmatprep.subr.bf16.mxu1 %v5216_v28 }
 0x2d7   : > { %4504 = vmatmul.mubr.msk.bf16.vlgmr.msra.gmra.mrb[96].mxu0 %vm1112_vm1, %v5917_v47  ;;  %v5170_v47 = vld [vmem:[%s6403_s3 + $0x40c] ss:$12 sps:$4 sm:$0xff]  }
 0x2d8   : > { %3330 = vmatpush1.bf16.msra.mxu0 %v5159_v21  ;;  %3361 = vmatprep.mubr.bf16.mxu0 %v5215_v2  ;;  %v5201_v21 = vld [vmem:[%s6404_s4 + $0x68] sm:$0xff]  }
 0x2d9   : > { %3331 = vmatprep.subr.bf16.mxu0 %v5164_v23  ;;  %4844 = vmatpush3.bf16.msra.mxu1 %v5185_v16 }
 0x2da   : > { %4845 = vmatprep.subr.bf16.mxu1 %v5216_v28 }
 0x2dc   : > { %3332 = vmatpush1.bf16.msra.mxu0 %v5162_v0 }
 0x2dd   : > { %3333 = vmatprep.subr.bf16.mxu0 %v5167_v22  ;;  %4846 = vmatpush3.bf16.msra.mxu1 %v5186_v50 }
 0x2de   : > { %4847 = vmatprep.subr.bf16.mxu1 %v5216_v28 }
 0x2e0   : > { %3334 = vmatpush1.bf16.msra.mxu0 %v5165_v48 }
 0x2e1   : > { %3335 = vmatprep.subr.bf16.mxu0 %v5170_v47  ;;  %4848 = vmatpush3.bf16.msra.mxu1 %v5187_v6 }
 0x2e2   : > { %4849 = vmatprep.subr.bf16.mxu1 %v5216_v28 }
 0x2e4   : > { %3336 = vmatpush1.bf16.msra.mxu0 %v5168_v25 }
 0x2e5   : > { %3503 = vmatprep.subr.bf16.mxu0 %v5173_v30  ;;  %4850 = vmatpush3.bf16.msra.mxu1 %v5188_v17  ;;  %v5202_v30 = vld [vmem:[%s6404_s4 + $0x28] sm:$0xff]  }
 0x2e6   : > { %4851 = vmatprep.subr.bf16.mxu1 %v5216_v28 }
 0x2e7   : > { %4534 = vmatmul.mubr.msk.bf16.vlgmr.msra.gmra.mrb[96].mxu0 %vm1112_vm1, %v5948_v5  ;;  %v5182_v5 = vld [vmem:[%s6403_s3 + $0x46c] ss:$12 sps:$4 sm:$0xff]  }
 0x2e8   : > { %3504 = vmatpush1.bf16.msra.mxu0 %v5171_v4  ;;  %3535 = vmatprep.mubr.bf16.mxu0 %v5215_v2  ;;  %v5180_v2 = vld [vmem:[%s6403_s3 + $0x468] ss:$12 sps:$4 sm:$0xff]  }
 0x2e9   : > { %3505 = vmatprep.subr.bf16.mxu0 %v5176_v24  ;;  %4852 = vmatpush3.bf16.msra.mxu1 %v5189_v18  ;;  %v5203_v4 = vld [vmem:[%s6404_s4 + $0x70] sm:$0xff]  }
 0x2ea   : > { %4853 = vmatprep.subr.bf16.mxu1 %v5216_v28  ;;  %v5194_v28 = vld [vmem:[%s6404_s4 + $0x8] sm:$0xff]   ;;  %v5204_v24 = vld [vmem:[%s6404_s4 + $0x30] sm:$0xff]  }
 0x2ec   : > { %3506 = vmatpush1.bf16.msra.mxu0 %v5174_v32  ;;  %v5205_v32 = vld [vmem:[%s6404_s4 + $0x78] sm:$0xff]  }
 0x2ed   : > { %3507 = vmatprep.subr.bf16.mxu0 %v5179_v57  ;;  %4854 = vmatpush3.bf16.msra.mxu1 %v5190_v60  ;;  %v5206_v57 = vld [vmem:[%s6404_s4 + $0x38] sm:$0xff]  }
 0x2f0   : > { %3508 = vmatpush1.bf16.msra.mxu0 %v5177_v34 }
 0x2f1   : > { %3509 = vmatprep.subr.bf16.mxu0 %v5182_v5 }
 0x2f4   : > { %3510 = vmatpush1.bf16.msra.mxu0 %v5180_v2 }
 0x2f5   : > { %4654 = vmatprep.subr.bf16.mxu0 %v5191_v20 }
 0x2f7   : > { %4564 = vmatmul.mubr.msk.bf16.vlgmr.msra.gmra.mrb[96].mxu0 %vm1112_vm1, %v5979_v12 }
 0x2f8   : > { %4655 = vmatpush3.bf16.msra.mxu0 %v5192_v7 }
 0x2f9   : > { %4656 = vmatprep.subr.bf16.mxu0 %v5193_v31 }
 0x2fc   : > { %4657 = vmatpush3.bf16.msra.mxu0 %v5194_v28 }
 0x2fd   : > { %4658 = vmatprep.subr.bf16.mxu0 %v5195_v9 }
 0x300   : > { %4659 = vmatpush3.bf16.msra.mxu0 %v5196_v10 }
 0x301   : > { %4660 = vmatprep.subr.bf16.mxu0 %v5197_v1 }
 0x302   : > { %v1846_v27 = vpop.f32.mrb[96].mxu1 }
 0x303   : > { %v4717_v37 = vpop.f32.mrb[97].mxu1 }
 0x304   : > { %v1849_v59 = vpop.f32.mrb[98].mxu1  ;;  %4661 = vmatpush3.bf16.msra.mxu0 %v5198_v15 }
 0x305   : > { %v4718_v14 = vpop.f32.mrb[99].mxu1  ;;  %4662 = vmatprep.subr.bf16.mxu0 %v5199_v19 }
 0x308   : > { %4663 = vmatpush3.bf16.msra.mxu0 %v5200_v39 }
 0x309   : > { %4664 = vmatprep.subr.bf16.mxu0 %v5201_v21 }
 0x30c   : > { %4665 = vmatpush3.bf16.msra.mxu0 %v5202_v30 }
 0x30d   : > { %4666 = vmatprep.subr.bf16.mxu0 %v5203_v4 }
 0x310   : > { %4667 = vmatpush3.bf16.msra.mxu0 %v5204_v24 }
 0x311   : > { %4668 = vmatprep.subr.bf16.mxu0 %v5205_v32 }
 0x312   : > { %v2014_v42 = vpop.f32.mrb[100].mxu1 }
 0x313   : > { %v4729_v46 = vpop.f32.mrb[101].mxu1 }
 0x314   : > { %v2017_v12 = vpop.f32.mrb[102].mxu1  ;;  %4669 = vmatpush3.bf16.msra.mxu0 %v5206_v57  ;;  %v3908_v57 = vld [vmem:[%s6405_s5 + $0x10] sm:$0xff] }
 0x315   : > { %v4730_v49 = vpop.f32.mrb[103].mxu1 }
 0x31a   : > { %v1695_v26 = vpop.f32.mrb[100].mxu0 }
 0x31b   : > { %v1847_v45 = vadd.f32 %v1846_v27, %v1695_v26  ;;  %v4705_v52 = vpop.f32.mrb[101].mxu0 }
 0x31c   : > { %v1698_v29 = vpop.f32.mrb[102].mxu0 }
 0x31d   : > { %v1850_v36 = vadd.f32 %v1849_v59, %v1698_v29  ;;  %v4706_v44 = vpop.f32.mrb[103].mxu0  ;;  %v2023_v8 = vadd.f32 %v2014_v42, %v1847_v45 }
 0x31f   : > { %v2026_v56 = vadd.f32 %v2017_v12, %v1850_v36 }
 0x322   : > { %v2188_v61 = vpop.f32.mrb[104].mxu1 }
 0x323   : > { %v2197_v58 = vadd.f32 %v2188_v61, %v2023_v8  ;;  %v4741_v62 = vpop.f32.mrb[105].mxu1 }
 0x324   : > { %v2191_v63 = vpop.f32.mrb[106].mxu1 }
 0x325   : > { %v2200_v51 = vadd.f32 %v2191_v63, %v2026_v56  ;;  %v4742_v3 = vpop.f32.mrb[107].mxu1 }
 0x326   : > { %v4135_v3 = vld [vmem:[%s6406_s6 + $0x3] ss:$8 sm:$0x7] }
 0x327   : > { %v3601_v1 = vrot.slane %v4135_v3, %v392_v43  ;;  %v3907_v43 = vld [vmem:[%s6405_s5 + $0x8] sm:$0xff] }
 0x332   : > { %v2362_v11 = vpop.f32.mrb[108].mxu1 }
 0x333   : > { %v2371_v54 = vadd.f32 %v2362_v11, %v2197_v58  ;;  %v4753_v33 = vpop.f32.mrb[109].mxu1 }
 0x334   : > { %v2365_v55 = vpop.f32.mrb[110].mxu1 }
 0x335   : > { %v2374_v35 = vadd.f32 %v2365_v55, %v2200_v51  ;;  %v4754_v13 = vpop.f32.mrb[111].mxu1  ;;  %v3604_v51 = vsub.s32 2, %v5407_v40  ;;  %v3906_v40 = vld [vmem:[%s6405_s5] sm:$0xff] }
 0x336   : > { %v3597_v13 = vrot.slane %v4135_v3, %v388_v41  ;;  %v4878_v32 = vpack.c.bf16 %v3907_v43, %v3906_v40 }
 0x337   : > { %v3605_v60 = vrot.slane %v4135_v3, %v3604_v51  ;;  %v333_v51 = vld [vmem:[%s6406_s6 + $0x6] ss:$0 sm:$0xff] }
 0x338   : > { %4879 = vmatprep.subr.bf16.mxu0 %v4878_v32 }
 0x342   : > { %v2536_v23 = vpop.f32.mrb[112].mxu1 }
 0x343   : > { %v2545_v0 = vadd.f32 %v2536_v23, %v2371_v54  ;;  %v4765_v22 = vpop.f32.mrb[113].mxu1 }
 0x344   : > { %v2539_v48 = vpop.f32.mrb[114].mxu1 }
 0x345   : > { %v2548_v47 = vadd.f32 %v2539_v48, %v2374_v35  ;;  %v4766_v25 = vpop.f32.mrb[115].mxu1 }
 0x352   : > { %v2710_v34 = vpop.f32.mrb[116].mxu1 }
 0x353   : > { %v2719_v5 = vadd.f32 %v2710_v34, %v2545_v0  ;;  %v4777_v2 = vpop.f32.mrb[117].mxu1  ;;  %v3909_v34 = vld [vmem:[%s6405_s5 + $0x18] sm:$0xff] }
 0x354   : > { %v2713_v27 = vpop.f32.mrb[118].mxu1  ;;  %v3910_v2 = vld [vmem:[%s6405_s5 + $0x20] sm:$0xff] }
 0x355   : > { %v2722_v37 = vadd.f32 %v2713_v27, %v2548_v47  ;;  %v4778_v59 = vpop.f32.mrb[119].mxu1  ;;  %v3911_v27 = vld [vmem:[%s6405_s5 + $0x28] sm:$0xff] }
 0x356   : > { %v3912_v59 = vld [vmem:[%s6405_s5 + $0x30] sm:$0xff] }
 0x362   : > { %v2884_v14 = vpop.f32.mrb[120].mxu1 }
 0x363   : > { %v2893_v53 = vadd.f32 %v2884_v14, %v2719_v5  ;;  %v4789_v38 = vpop.f32.mrb[121].mxu1  ;;  %v4882_v5 = vpack.c.bf16 %v3909_v34, %v3908_v57  ;;  %v3913_v14 = vld [vmem:[%s6405_s5 + $0x38] sm:$0xff] }
 0x364   : > { %v2887_v42 = vpop.f32.mrb[122].mxu1 }
 0x365   : > { %v2896_v46 = vadd.f32 %v2887_v42, %v2722_v37  ;;  %v4790_v12 = vpop.f32.mrb[123].mxu1  ;;  %v4886_v37 = vpack.c.bf16 %v3911_v27, %v3910_v2 }
 0x372   : > { %v3058_v16 = vpop.f32.mrb[124].mxu1 }
 0x373   : > { %v3067_v49 = vadd.f32 %v3058_v16, %v2893_v53  ;;  %v4801_v50 = vpop.f32.mrb[125].mxu1  ;;  %v4890_v53 = vpack.c.bf16 %v3913_v14, %v3912_v59 }
 0x374   : > { %v3061_v26 = vpop.f32.mrb[126].mxu1 }
 0x375   : > { %v3070_v6 = vadd.f32 %v3061_v26, %v2896_v46  ;;  %v4802_v45 = vpop.f32.mrb[127].mxu1 }
 0x382   : > { %v3232_v52 = vpop.f32.mrb[128].mxu1 }
 0x383   : > { %v3241_v29 = vadd.f32 %v3232_v52, %v3067_v49  ;;  %v4813_v36 = vpop.f32.mrb[129].mxu1  ;;  %v331_v49 = vld [vmem:[%s6406_s6 + $0x4] ss:$0 sm:$0xff] }
 0x384   : > { %v3235_v44 = vpop.f32.mrb[130].mxu1 }
 0x385   : > { %v3244_v8 = vadd.f32 %v3235_v44, %v3070_v6  ;;  %v4814_v56 = vpop.f32.mrb[131].mxu1 }
 0x392   : > { %v3406_v17 = vpop.f32.mrb[132].mxu1 }
 0x393   : > { %v3415_v61 = vadd.f32 %v3406_v17, %v3241_v29  ;;  %v4825_v58 = vpop.f32.mrb[133].mxu1 }
 0x394   : > { %v3409_v62 = vpop.f32.mrb[134].mxu1 }
 0x395   : > { %v3418_v63 = vadd.f32 %v3409_v62, %v3244_v8  ;;  %v4826_v18 = vpop.f32.mrb[135].mxu1 }
 0x3a2   : > { %v3580_v20 = vpop.f32.mrb[136].mxu1 }
 0x3a3   : > { %v3589_v7 = vadd.f32 %v3580_v20, %v3415_v61  ;;  %v4837_v31 = vpop.f32.mrb[137].mxu1  ;;  %v332_v61 = vld [vmem:[%s6406_s6 + $0x5] ss:$0 sm:$0xff] }
 0x3a4   : > { %v3583_v28 = vpop.f32.mrb[138].mxu1 }
 0x3a5   : > { %v3611_v9 = vadd.f32 %v3605_v60, %v3589_v7  ;;  %v3592_v11 = vadd.f32 %v3583_v28, %v3418_v63  ;;  %v4838_v54 = vpop.f32.mrb[139].mxu1 }
 0x3a7   : > { %v3617_v33 = vmax.f32 %v3611_v9, 0.0  ;;  %v3614_v55 = vadd.f32 %v3605_v60, %v3592_v11  ;;  %v334_v9 = vld [vmem:[%s6406_s6 + $0x7] ss:$0 sm:$0xff] }
 0x3a9   : > { %3623 = vst [vmem:[%s317_s29 + $0x10] sm:$0xff] %v3617_v33  ;;  %v3620_v10 = vmax.f32 %v3614_v55, 0.0 }
 0x3ab   : > { %3626 = vst [vmem:[%s317_s29 + $0x28] sm:$0xff] %v3620_v10  ;;  %v3629_v35 = vpack.c.bf16 %v3620_v10, %v3617_v33 }
 0x3ad   : > { %4856 = vmatmul.mubr.bf16.vlgmr.msra.gmra.mrb[140].mxu1 %v3629_v35 }
 0x3ca   : > { %v3537_v15 = vpop.f32.mrb[96].mxu0 }
 0x3cb   : > { %v3609_v19 = vadd.f32 %v3597_v13, %v3537_v15  ;;  %v3539_v39 = vpop.f32.mrb[97].mxu0 }
 0x3cc   : > { %v3610_v21 = vadd.f32 %v3601_v1, %v3539_v39  ;;  %v3541_v23 = vpop.f32.mrb[98].mxu0 }
 0x3cd   : > { %v3615_v0 = vmax.f32 %v3609_v19, 0.0  ;;  %v3612_v22 = vadd.f32 %v3597_v13, %v3541_v23  ;;  %v3543_v48 = vpop.f32.mrb[99].mxu0 }
 0x3ce   : > { %v3616_v47 = vmax.f32 %v3610_v21, 0.0  ;;  %v3613_v25 = vadd.f32 %v3601_v1, %v3543_v48 }
 0x3cf   : > { %3621 = vst [vmem:[%s317_s29] sm:$0xff] %v3615_v0  ;;  %v3618_v30 = vmax.f32 %v3612_v22, 0.0 }
 0x3d0   : > { %3622 = vst [vmem:[%s317_s29 + $0x8] sm:$0xff] %v3616_v47  ;;  %v3619_v4 = vmax.f32 %v3613_v25, 0.0 }
 0x3d1   : > { %3624 = vst [vmem:[%s317_s29 + $0x18] sm:$0xff] %v3618_v30  ;;  %v3627_v24 = vpack.c.bf16 %v3618_v30, %v3615_v0 }
 0x3d2   : > { %3625 = vst [vmem:[%s317_s29 + $0x20] sm:$0xff] %v3619_v4  ;;  %v3628_v41 = vpack.c.bf16 %v3619_v4, %v3616_v47 }
 0x3d4   : > { %3854 = vmatprep.mubr.bf16.mxu0 %v3628_v41 }
 0x3d5   : > { %3855 = vmatmul.mubr.bf16.vlgmr.msra.gmra.mrb[104].mxu0 %v3627_v24 }
 0x3d6   : > { %4881 = vmatpush3.bf16.msra.mxu0 %v4878_v32 }
 0x3d7   : > { %4883 = vmatprep.subr.bf16.mxu0 %v4882_v5 }
 0x3da   : > { %4885 = vmatpush3.bf16.msra.mxu0 %v4882_v5 }
 0x3db   : > { %4887 = vmatprep.subr.bf16.mxu0 %v4886_v37 }
 0x3de   : > { %4889 = vmatpush3.bf16.msra.mxu0 %v4886_v37 }
 0x3df   : > { %4891 = vmatprep.subr.bf16.mxu0 %v4890_v53 }
 0x3e2   : > { %4893 = vmatpush3.bf16.msra.mxu0 %v4890_v53 }
 0x480   : > { %v3897_v38 = vpop.f32.mrb[140].mxu1 }
 0x481   : > { %v4857_v42 = vpop.f32.mrb[141].mxu1 }
 0x482   : > { %v3900_v46 = vpop.f32.mrb[142].mxu1 }
 0x483   : > { %v4858_v12 = vpop.f32.mrb[143].mxu1 }
 0x4a8   : > { %v4670_v16 = vpop.f32.mrb[104].mxu0 }
 0x4a9   : > { %v4671_v50 = vpop.f32.mrb[105].mxu0 }
 0x4aa   : > { %v4672_v26 = vadd.f32 %v4671_v50, %v4670_v16  ;;  %v4673_v6 = vpop.f32.mrb[106].mxu0 }
 0x4ab   : > { %v4674_v45 = vpop.f32.mrb[107].mxu0 }
 0x4ac   : > { %v3857_v52 = vadd.f32 %v4672_v26, %v331_v49  ;;  %v4675_v29 = vadd.f32 %v4674_v45, %v4673_v6 }
 0x4ae   : > { %v3898_v36 = vadd.f32 %v3897_v38, %v3857_v52  ;;  %v3860_v44 = vadd.f32 %v4675_v29, %v331_v49 }
 0x4b0   : > { %v3904_v8 = vmax.f32 %v3898_v36, 0.0  ;;  %v3901_v56 = vadd.f32 %v3900_v46, %v3860_v44 }
 0x4b2   : > { %v3905_v17 = vmax.f32 %v3901_v56, 0.0  ;;  %4875 = vmatprep.mubr.msk.f32.mxu0 %vm1112_vm1, %v3904_v8 }
 0x4b4   : > { %4876 = vmatmul.mubr.msk.f32.vlgmr.msra.gmra.mrb[108].mxu0 %vm1112_vm1, %v3905_v17 }
 0x587   : > { %v4877_v58 = vpop.f32.mrb[108].mxu0 }
 0x588   : > { %v3992_v62 = vadd.f32 %v4877_v58, %v332_v61  ;;  %v3986_v63 = vpop.f32.mrb[109].mxu0 }
 0x589   : > { %v3987_v18 = vadd.f32 %v3986_v63, %v332_v61 }
 0x58a   : > { %v3996_v3 = vmax.f32 %v3992_v62, 0.0 }
 0x58b   : > { %v3995_v60 = vmax.f32 %v3987_v18, 0.0 }
 0x58c   : > { %v3998_v31 = vmul.f32 %v3996_v3, %v333_v51 }
 0x58d   : > { %4009 = vrot.lane.b32.xlu1 %v3995_v60, %s5218_s10  ;;  %v3997_v20 = vmul.f32 %v3995_v60, %v333_v51 }
 0x58e   : > { %v4002_v28 = vsel %vm526_vm0, %v3998_v31, 0.0 }
 0x58f   : > { %v3999_v7 = vsel %vm526_vm0, %v3997_v20, 0.0 }
 0x590   : > { %4000 = vadd.xlane.f32.xlu0 %v3999_v7 }
 0x591   : > { %4011 = vrot.lane.b32.xlu1 %v3996_v3, %s5218_s10 }
 0x594   : > { %4003 = vadd.xlane.f32.xlu0 %v4002_v28 }
 0x5ff   : > { %v4010_v10 = vpop.permute.xlu1 %4009 }
 0x600   : > { %v4023_v35 = vsel %vm1112_vm1, %v3904_v8, %v4010_v10 }
 0x603   : > { %v4012_v13 = vpop.permute.xlu1 %4011 }
 0x604   : > { %v4024_v39 = vsel %vm1112_vm1, %v3905_v17, %v4012_v13 }
 0x61d   : > { %v4001_v11 = vpop.xlane.xlu0 %4000 }
 0x61e   : > { %v4005_v54 = vadd.f32 %v4001_v11, %v334_v9 }
 0x620   : > { %4017 = vrot.lane.b32.xlu0 %v4005_v54, %s5219_s13 }
 0x621   : > { %v4004_v33 = vpop.xlane.xlu0 %4003 }
 0x622   : > { %v4006_v55 = vadd.f32 %v4004_v33, %v334_v9 }
 0x624   : > { %4019 = vrot.lane.b32.xlu1 %v4006_v55, %s5219_s13 }
 0x692   : > { %v4018_v1 = vpop.permute.xlu0 %4017 }
 0x693   : > { %v4026_v15 = vsel %vm4025_vm3, %v4023_v35, %v4018_v1 }
 0x694   : > { %v4029_v19 = vsel %vm4028_vm4, %v4026_v15, 0.0 }
 0x695   : > { %4031 = vst [vmem:[%s323_s18] sm:$0xff] %v4029_v19 }
 0x696   : > { %v4020_v21 = vpop.permute.xlu1 %4019 }
 0x697   : > { %v4027_v23 = vsel %vm4025_vm3, %v4024_v39, %v4020_v21 }
 0x698   : > { %v4030_v0 = vsel %vm4028_vm4, %v4027_v23, 0.0 }
 0x699   : > { %4032 = vst [vmem:[%s323_s18 + $0x8] sm:$0xff] %v4030_v0 }
 0x69a PF: > { %s19_s27 = sadd.s32 1, %s5213_s27  }
 0x69b   : > { %p16_p5 = scmp.ge.s32.totalorder %s19_s27, 4  }
 0x69d   :  { %18 = sbr.rel (!%p16_p5) target bundleno = 1 (0x1), region = 102 }

</bundles_post_ra>
